<compile_context>
chip_gen: v7x
topology: tpu7x:2x2x1
jax: 0.10.0
libtpu: 0.0.40
codegen_flags: <defaults>
</compile_context>

<pallas_src>
import functools

import numpy as np

import jax
import jax.numpy as jnp
from jax.experimental import pallas as pl
from jax.experimental.pallas import tpu as pltpu

LANE = 128                      # lane padding for the HBM-visible logits only
VMEM_LIMIT = 32 * 1024 * 1024   # explicit scoped-VMEM limit (safe v5e/v6e/v7x)


# -----------------------------------------------------------------------------
# Fused kernel: conv1 + BN + ReLU -> conv2 + BN + ReLU -> GAP -> fc
# -----------------------------------------------------------------------------
def stem_gap_fc_kernel(x_ref, w1_ref, b1_ref, w2_ref, b2_ref, sel_ref,
                       fcw_ref, fcb_ref, o_ref, f1_ref, *,
                       row_stride, kw1, kw2, n_taps1, n_taps2, lt1, lt2,
                       inv_hw):
    """One batch block (BB images) per grid step; everything stays in VMEM.

    x_ref   : (BB*H2*W2, 4*Cin) bf16  flat row-major space-to-depth input map
    w1_ref  : (kh1*kw1, 4*Cin, C1) bf16  per-tap conv1 weights (BN folded)
    b1_ref  : (1, C1)  f32               folded BN bias
    w2_ref  : (kh2*kw2, C1, C2) bf16     per-tap conv2 weights (BN folded)
    b2_ref  : (1, C2)  f32
    sel_ref : (BB, LT2) bf16  0/1 matrix selecting the valid conv2 outputs
    fcw_ref : (C2, 128) bf16  classifier weights (128-lane padded)
    fcb_ref : (1, 128)  f32
    o_ref   : (BB, 128) f32   logits (lane-dense store)
    f1_ref  : (LT1, C1) bf16  VMEM scratch: conv1 feature map, never hits HBM

    Each VALID conv is kh*kw shifted full-map matmuls: tap (ki,kj) contributes
    dot(map[ki*W+kj :][:LT], w_tap).  Flat rows that straddle an image row /
    image boundary produce garbage values, but those rows are never selected
    downstream (the LT windows + sel_ref), so one large-M matmul per tap
    replaces per-output-row micro-dots with no im2col copy and no reshapes.
    """
    c1 = w1_ref.shape[-1]
    c2 = w2_ref.shape[-1]

    # ---- conv1: stride-2 3x3 stem remapped to stride-1 2x2 on the s2d map ---
    acc1 = jnp.zeros((lt1, c1), jnp.float32)
    for t in range(n_taps1):                       # 4 taps, static unroll
        ki, kj = divmod(t, kw1)
        acc1 = acc1 + jnp.dot(
            x_ref[pl.ds(ki * row_stride + kj, lt1), :], w1_ref[t],
            preferred_element_type=jnp.float32)
    # f32 bias + ReLU epilogue (v5e-safe), store bf16 feature map in VMEM.
    f1_ref[...] = jnp.maximum(acc1 + b1_ref[...], 0.0).astype(f1_ref.dtype)

    # ---- conv2: 3x3 stride-1 over the VMEM-resident f1 map ------------------
    acc2 = jnp.zeros((lt2, c2), jnp.float32)
    for t in range(n_taps2):                       # 9 taps, static unroll
        ki, kj = divmod(t, kw2)
        acc2 = acc2 + jnp.dot(
            f1_ref[pl.ds(ki * row_stride + kj, lt2), :], w2_ref[t],
            preferred_element_type=jnp.float32)
    f2 = jnp.maximum(acc2 + b2_ref[...], 0.0).astype(jnp.bfloat16)   # (LT2,C2)

    # ---- global average pool (0/1 selection matmul) + fc head ---------------
    pooled = jnp.dot(sel_ref[...], f2,
                     preferred_element_type=jnp.float32) * inv_hw    # (BB,C2)
    logits = jnp.dot(pooled.astype(jnp.bfloat16), fcw_ref[...],
                     preferred_element_type=jnp.float32) + fcb_ref[...]
    o_ref[...] = logits
    # TODO(synk): for real Inception resolution (299x299) the static tap unroll
    # stays at 4/9 iterations, but LT grows ~B*150^2; then tile the M dimension
    # with lax.fori_loop(unroll=True) row blocks instead of one giant matmul.


def stem_gap_fc(x_flat, params, sel, *, bb, hw2, row_stride,
                kw1, kw2, n_taps1, n_taps2, lt1, lt2, inv_hw, n_blocks):
    csd = x_flat.shape[-1]
    c1 = params["w1"].shape[-1]
    c2 = params["w2"].shape[-1]
    kern = functools.partial(
        stem_gap_fc_kernel, row_stride=row_stride, kw1=kw1, kw2=kw2,
        n_taps1=n_taps1, n_taps2=n_taps2, lt1=lt1, lt2=lt2, inv_hw=inv_hw)
    return pl.pallas_call(
        kern,
        out_shape=jax.ShapeDtypeStruct((n_blocks * bb, LANE), jnp.float32),
        grid=(n_blocks,),
        in_specs=[
            # per-step input map (BB images); all other operands are
            # grid-invariant (constant index_map => fetched once).
            pl.BlockSpec((bb * hw2, csd), lambda i: (i, 0)),
            pl.BlockSpec((n_taps1, csd, c1), lambda i: (0, 0, 0)),
            pl.BlockSpec((1, c1), lambda i: (0, 0)),
            pl.BlockSpec((n_taps2, c1, c2), lambda i: (0, 0, 0)),
            pl.BlockSpec((1, c2), lambda i: (0, 0)),
            pl.BlockSpec((bb, lt2), lambda i: (0, 0)),
            pl.BlockSpec((c2, LANE), lambda i: (0, 0)),
            pl.BlockSpec((1, LANE), lambda i: (0, 0)),
        ],
        out_specs=pl.BlockSpec((bb, LANE), lambda i: (i, 0)),
        scratch_shapes=[pltpu.VMEM((lt1, c1), jnp.bfloat16)],
        compiler_params=pltpu.CompilerParams(
            dimension_semantics=("parallel",),
            vmem_limit_bytes=VMEM_LIMIT),
    )(x_flat, params["w1"], params["b1"], params["w2"], params["b2"],
      sel, params["fc_w"], params["fc_b"])


# -----------------------------------------------------------------------------
# Parameter construction: BN folding, stride-2 -> space-to-depth weight remap.
# -----------------------------------------------------------------------------
def fold_bn(gamma, beta, mean, var, eps=1e-3):
    scale = gamma / jnp.sqrt(var + eps)
    return scale, beta - mean * scale


def make_params(key, cin, c1, c2, n_classes):
    ks = jax.random.split(key, 8)

    # --- conv1 (Conv2d_1a_3x3): 3x3 stride-2 + BN + ReLU --------------------
    w1_t = jax.random.normal(ks[0], (c1, cin, 3, 3), jnp.float32) * 0.1
    s1, b1 = fold_bn(jnp.ones(c1), jnp.zeros(c1),
                     0.1 * jax.random.normal(ks[2], (c1,)),
                     jnp.ones(c1) + 0.1 * jax.random.uniform(ks[3], (c1,)))
    w1_t = w1_t * s1[:, None, None, None]          # fold BN scale into weights
    # Remap the stride-2 3x3 kernel to a stride-1 2x2 kernel on the 2x2
    # space-to-depth input (channel order (di, dj, c)); out-of-range taps = 0.
    w1_sd = jnp.zeros((2, 2, 4 * cin, c1), jnp.float32)
    for dy in range(2):
        for dx in range(2):
            for di in range(2):
                for dj in range(2):
                    ki, kj = 2 * dy + di, 2 * dx + dj
                    if ki < 3 and kj < 3:
                        blk = jnp.transpose(w1_t[:, :, ki, kj], (1, 0))
                        w1_sd = w1_sd.at[
                            dy, dx,
                            (di * 2 + dj) * cin:(di * 2 + dj + 1) * cin,
                            :].set(blk)
    w1 = w1_sd.reshape(4, 4 * cin, c1)             # no 128-lane padding (VMEM-internal)

    # --- conv2 (Conv2d_2a_3x3): 3x3 stride-1 + BN + ReLU --------------------
    w2_t = jax.random.normal(ks[1], (c2, c1, 3, 3), jnp.float32) * 0.1
    s2, b2 = fold_bn(jnp.ones(c2), jnp.zeros(c2),
                     0.1 * jax.random.normal(ks[4], (c2,)),
                     jnp.ones(c2) + 0.1 * jax.random.uniform(ks[5], (c2,)))
    w2_t = w2_t * s2[:, None, None, None]
    w2 = jnp.transpose(w2_t, (2, 3, 1, 0)).reshape(9, c1, c2)

    # --- classifier head (the replaced fc: Linear(in_features, n_classes)) --
    # Only the HBM-visible logits are padded to 128 lanes.
    fc_w_t = jax.random.normal(ks[6], (c2, n_classes), jnp.float32) * 0.1
    fc_b_t = jax.random.normal(ks[7], (n_classes,), jnp.float32) * 0.01
    fc_w = jnp.zeros((c2, LANE), jnp.float32).at[:, :n_classes].set(fc_w_t)
    fc_b = jnp.zeros((1, LANE), jnp.float32).at[0, :n_classes].set(fc_b_t)

    return dict(w1=w1.astype(jnp.bfloat16), b1=b1.reshape(1, c1),
                w2=w2.astype(jnp.bfloat16), b2=b2.reshape(1, c2),
                fc_w=fc_w.astype(jnp.bfloat16), fc_b=fc_b)


def _build_sel(bb, hw2, w2d, oh2, ow2, lt2):
    """0/1 selection matrix: row b marks the valid conv2 outputs of image b."""
    sel = np.zeros((bb, lt2), np.float32)
    for b in range(bb):
        base = b * hw2
        for i2 in range(oh2):
            sel[b, base + i2 * w2d: base + i2 * w2d + ow2] = 1.0
    return sel


# -----------------------------------------------------------------------------
# Forward
# -----------------------------------------------------------------------------
@functools.partial(jax.jit, static_argnames=("n_classes", "batch_block"))
def hair_classifier_forward(x_nchw, params, *, n_classes, batch_block=None):
    n, c, h, w = x_nchw.shape
    h2, w2d = h // 2, w // 2
    hw2 = h2 * w2d
    kh1 = kw1 = 2                      # stride-2 3x3 stem == stride-1 2x2 on s2d map
    kh2 = kw2 = 3
    oh1, ow1 = h2 - kh1 + 1, w2d - kw1 + 1
    oh2, ow2 = oh1 - kh2 + 1, ow1 - kw2 + 1

    # Batch block: flatten BB images into the matmul M dimension per grid step
    # (BB=8 -> M ~ 512 at this resolution, native MXU height on v6e/v7x; the
    # remaining grid steps shard across v7x's two TensorCores).
    bb = batch_block if batch_block is not None else (n if n <= 8 else 8)
    n_pad = -(-n // bb) * bb
    lt1 = (bb - 1) * hw2 + (oh1 - 1) * w2d + ow1   # flat rows holding conv1 outputs
    lt2 = (bb - 1) * hw2 + (oh2 - 1) * w2d + ow2   # flat rows holding conv2 outputs
    inv_hw = 1.0 / float(oh2 * ow2)                # GAP mean factor (oh2*ow2, not oh2^2)

    # NCHW -> NHWC -> 2x2 space-to-depth -> flat (N*H2*W2, 4C) row-major map.
    # Pure layout ops on a tiny tensor; XLA fuses them into one copy.
    x = jnp.transpose(x_nchw, (0, 2, 3, 1)).astype(jnp.float32)
    y = x.reshape(n, h2, 2, w2d, 2, c)
    y = jnp.transpose(y, (0, 1, 3, 2, 4, 5)).reshape(n, hw2, 4 * c)
    if n_pad != n:
        y = jnp.pad(y, ((0, n_pad - n), (0, 0), (0, 0)))
    y = y.reshape(n_pad * hw2, 4 * c).astype(jnp.bfloat16)

    sel = jnp.asarray(_build_sel(bb, hw2, w2d, oh2, ow2, lt2), jnp.bfloat16)

    logits = stem_gap_fc(y, params, sel, bb=bb, hw2=hw2, row_stride=w2d,
                         kw1=kw1, kw2=kw2, n_taps1=kh1 * kw1, n_taps2=kh2 * kw2,
                         lt1=lt1, lt2=lt2, inv_hw=inv_hw,
                         n_blocks=n_pad // bb)
    return logits[:n, :n_classes]


# -----------------------------------------------------------------------------
# Pure-XLA f32 reference of the same stem + GAP + fc (for a tolerance check).
# -----------------------------------------------------------------------------
def reference_forward(x_nchw, params, *, n_classes):
    n, c, h, w = x_nchw.shape
    h2, w2d = h // 2, w // 2
    c1 = params["w1"].shape[-1]
    c2 = params["w2"].shape[-1]
    x = jnp.transpose(x_nchw, (0, 2, 3, 1)).astype(jnp.float32)
    xs = x.reshape(n, h2, 2, w2d, 2, c).transpose((0, 1, 3, 2, 4, 5))
    xs = xs.reshape(n, h2, w2d, 4 * c)
    w1 = params["w1"].astype(jnp.float32).reshape(2, 2, 4 * c, c1)
    oh1, ow1 = h2 - 1, w2d - 1
    a1 = sum(jnp.einsum("nijc,cd->nijd",
                        xs[:, dy:dy + oh1, dx:dx + ow1, :], w1[dy, dx])
             for dy in range(2) for dx in range(2))
    f1 = jax.nn.relu(a1 + params["b1"].astype(jnp.float32)[0])
    w2 = params["w2"].astype(jnp.float32).reshape(3, 3, c1, c2)
    oh2, ow2 = oh1 - 2, ow1 - 2
    a2 = sum(jnp.einsum("nijc,cd->nijd",
                        f1[:, ki:ki + oh2, kj:kj + ow2, :], w2[ki, kj])
             for ki in range(3) for kj in range(3))
    f2 = jax.nn.relu(a2 + params["b2"].astype(jnp.float32)[0])
    pooled = jnp.mean(f2, axis=(1, 2))
    logits = pooled @ params["fc_w"].astype(jnp.float32) + params["fc_b"][0]
    return logits[:, :n_classes]


if __name__ == "__main__":
    key = jax.random.PRNGKey(0)
    k_x, k_p = jax.random.split(key)

    N, CIN, H, W = 2, 4, 16, 16        # small NCHW input, PyTorch convention
    C1, C2, N_CLASSES = 32, 64, 2

    x = jax.random.normal(k_x, (N, CIN, H, W), jnp.float32)
    params = make_params(k_p, CIN, C1, C2, N_CLASSES)

    out = jax.block_until_ready(
        hair_classifier_forward(x, params, n_classes=N_CLASSES))

    assert out.shape == (N, N_CLASSES), out.shape
    assert out.dtype == jnp.float32

    # bf16 MXU vs f32 reference: loose but meaningful tolerance.
    ref = jax.block_until_ready(reference_forward(x, params, n_classes=N_CLASSES))
    err = float(jnp.max(jnp.abs(out - ref)))
    assert err < 8e-2, f"max |kernel - reference| = {err}"

    print("KERNEL_OK")
</pallas_src>

<mosaic_0001>
module attributes {stable_mosaic.version = 11 : i64} {
  func.func @stem_gap_fc_kernel(%arg0: i32, %arg1: memref<128x16xbf16, #tpu.memory_space<vmem>>, %arg2: memref<4x16x32xbf16, #tpu.memory_space<vmem>>, %arg3: memref<1x32xf32, #tpu.memory_space<vmem>>, %arg4: memref<9x32x64xbf16, #tpu.memory_space<vmem>>, %arg5: memref<1x64xf32, #tpu.memory_space<vmem>>, %arg6: memref<2x101xbf16, #tpu.memory_space<vmem>>, %arg7: memref<64x128xbf16, #tpu.memory_space<vmem>>, %arg8: memref<1x128xf32, #tpu.memory_space<vmem>>, %arg9: memref<2x128xf32, #tpu.memory_space<vmem>>, %arg10: memref<119x32xbf16, #tpu.memory_space<vmem>>) attributes {dimension_semantics = [#tpu.dimension_semantics<parallel>], iteration_bounds = array<i64: 1>, scalar_prefetch = 0 : i64, scratch_operands = 1 : i64, tpu.core_type = #tpu.core_type<tc>, window_params = [{transform_indices = @transform_0, window_bounds = array<i64: 128, 16>}, {pipeline_mode = #tpu.pipeline_mode<synchronous>, transform_indices = @transform_1, window_bounds = array<i64: 4, 16, 32>}, {pipeline_mode = #tpu.pipeline_mode<synchronous>, transform_indices = @transform_2, window_bounds = array<i64: 1, 32>}, {pipeline_mode = #tpu.pipeline_mode<synchronous>, transform_indices = @transform_3, window_bounds = array<i64: 9, 32, 64>}, {pipeline_mode = #tpu.pipeline_mode<synchronous>, transform_indices = @transform_4, window_bounds = array<i64: 1, 64>}, {pipeline_mode = #tpu.pipeline_mode<synchronous>, transform_indices = @transform_5, window_bounds = array<i64: 2, 101>}, {pipeline_mode = #tpu.pipeline_mode<synchronous>, transform_indices = @transform_6, window_bounds = array<i64: 64, 128>}, {pipeline_mode = #tpu.pipeline_mode<synchronous>, transform_indices = @transform_7, window_bounds = array<i64: 1, 128>}, {transform_indices = @transform_8, window_bounds = array<i64: 2, 128>}]} {
    %cst = arith.constant 0.000000e+00 : f32
    %0 = vector.broadcast %cst : f32 to vector<119x32xf32>
    %c0 = arith.constant 0 : index
    %c0_0 = arith.constant 0 : index
    %1 = vector.load %arg1[%c0, %c0_0] : memref<128x16xbf16, #tpu.memory_space<vmem>>, vector<119x16xbf16>
    %c0_1 = arith.constant 0 : index
    %c0_2 = arith.constant 0 : index
    %c0_3 = arith.constant 0 : index
    %2 = vector.load %arg2[%c0_1, %c0_2, %c0_3] : memref<4x16x32xbf16, #tpu.memory_space<vmem>>, vector<1x16x32xbf16>
    %3 = vector.shape_cast %2 : vector<1x16x32xbf16> to vector<16x32xbf16>
    %cst_4 = arith.constant dense<0.000000e+00> : vector<119x32xf32>
    %4 = tpu.matmul %1, %3, %cst_4 {dimension_numbers = #tpu.dot_dimension_numbers<[1], [0], [0], [1], [0, 0, 1, 1], [], []>} : vector<119x16xbf16>, vector<16x32xbf16>, vector<119x32xf32> -> vector<119x32xf32>
    %5 = arith.addf %0, %4 : vector<119x32xf32>
    %c1 = arith.constant 1 : index
    %c0_5 = arith.constant 0 : index
    %6 = vector.load %arg1[%c1, %c0_5] : memref<128x16xbf16, #tpu.memory_space<vmem>>, vector<119x16xbf16>
    %c1_6 = arith.constant 1 : index
    %c0_7 = arith.constant 0 : index
    %c0_8 = arith.constant 0 : index
    %7 = vector.load %arg2[%c1_6, %c0_7, %c0_8] : memref<4x16x32xbf16, #tpu.memory_space<vmem>>, vector<1x16x32xbf16>
    %8 = vector.shape_cast %7 : vector<1x16x32xbf16> to vector<16x32xbf16>
    %cst_9 = arith.constant dense<0.000000e+00> : vector<119x32xf32>
    %9 = tpu.matmul %6, %8, %cst_9 {dimension_numbers = #tpu.dot_dimension_numbers<[1], [0], [0], [1], [0, 0, 1, 1], [], []>} : vector<119x16xbf16>, vector<16x32xbf16>, vector<119x32xf32> -> vector<119x32xf32>
    %10 = arith.addf %5, %9 : vector<119x32xf32>
    %c8 = arith.constant 8 : index
    %c0_10 = arith.constant 0 : index
    %11 = vector.load %arg1[%c8, %c0_10] : memref<128x16xbf16, #tpu.memory_space<vmem>>, vector<119x16xbf16>
    %c2 = arith.constant 2 : index
    %c0_11 = arith.constant 0 : index
    %c0_12 = arith.constant 0 : index
    %12 = vector.load %arg2[%c2, %c0_11, %c0_12] : memref<4x16x32xbf16, #tpu.memory_space<vmem>>, vector<1x16x32xbf16>
    %13 = vector.shape_cast %12 : vector<1x16x32xbf16> to vector<16x32xbf16>
    %cst_13 = arith.constant dense<0.000000e+00> : vector<119x32xf32>
    %14 = tpu.matmul %11, %13, %cst_13 {dimension_numbers = #tpu.dot_dimension_numbers<[1], [0], [0], [1], [0, 0, 1, 1], [], []>} : vector<119x16xbf16>, vector<16x32xbf16>, vector<119x32xf32> -> vector<119x32xf32>
    %15 = arith.addf %10, %14 : vector<119x32xf32>
    %c9 = arith.constant 9 : index
    %c0_14 = arith.constant 0 : index
    %16 = vector.load %arg1[%c9, %c0_14] : memref<128x16xbf16, #tpu.memory_space<vmem>>, vector<119x16xbf16>
    %c3 = arith.constant 3 : index
    %c0_15 = arith.constant 0 : index
    %c0_16 = arith.constant 0 : index
    %17 = vector.load %arg2[%c3, %c0_15, %c0_16] : memref<4x16x32xbf16, #tpu.memory_space<vmem>>, vector<1x16x32xbf16>
    %18 = vector.shape_cast %17 : vector<1x16x32xbf16> to vector<16x32xbf16>
    %cst_17 = arith.constant dense<0.000000e+00> : vector<119x32xf32>
    %19 = tpu.matmul %16, %18, %cst_17 {dimension_numbers = #tpu.dot_dimension_numbers<[1], [0], [0], [1], [0, 0, 1, 1], [], []>} : vector<119x16xbf16>, vector<16x32xbf16>, vector<119x32xf32> -> vector<119x32xf32>
    %20 = arith.addf %15, %19 : vector<119x32xf32>
    %c0_18 = arith.constant 0 : index
    %c0_19 = arith.constant 0 : index
    %21 = vector.load %arg3[%c0_18, %c0_19] : memref<1x32xf32, #tpu.memory_space<vmem>>, vector<1x32xf32>
    %22 = vector.broadcast %21 : vector<1x32xf32> to vector<119x32xf32>
    %23 = arith.addf %20, %22 : vector<119x32xf32>
    %cst_20 = arith.constant 0.000000e+00 : f32
    %24 = vector.broadcast %cst_20 : f32 to vector<119x32xf32>
    %25 = arith.maximumf %23, %24 : vector<119x32xf32>
    %26 = arith.truncf %25 : vector<119x32xf32> to vector<119x32xbf16>
    %c0_21 = arith.constant 0 : index
    %c0_22 = arith.constant 0 : index
    %27 = vector.load %arg10[%c0_21, %c0_22] : memref<119x32xbf16, #tpu.memory_space<vmem>>, vector<119x32xbf16>
    tpu.vector_store %arg10[%c0_21, %c0_22], %26 {strides = array<i32>} : memref<119x32xbf16, #tpu.memory_space<vmem>>, vector<119x32xbf16>,
    %cst_23 = arith.constant 0.000000e+00 : f32
    %28 = vector.broadcast %cst_23 : f32 to vector<101x64xf32>
    %c0_24 = arith.constant 0 : index
    %c0_25 = arith.constant 0 : index
    %29 = vector.load %arg10[%c0_24, %c0_25] : memref<119x32xbf16, #tpu.memory_space<vmem>>, vector<101x32xbf16>
    %c0_26 = arith.constant 0 : index
    %c0_27 = arith.constant 0 : index
    %c0_28 = arith.constant 0 : index
    %30 = vector.load %arg4[%c0_26, %c0_27, %c0_28] : memref<9x32x64xbf16, #tpu.memory_space<vmem>>, vector<1x32x64xbf16>
    %31 = vector.shape_cast %30 : vector<1x32x64xbf16> to vector<32x64xbf16>
    %cst_29 = arith.constant dense<0.000000e+00> : vector<101x64xf32>
    %32 = tpu.matmul %29, %31, %cst_29 {dimension_numbers = #tpu.dot_dimension_numbers<[1], [0], [0], [1], [0, 0, 1, 1], [], []>} : vector<101x32xbf16>, vector<32x64xbf16>, vector<101x64xf32> -> vector<101x64xf32>
    %33 = arith.addf %28, %32 : vector<101x64xf32>
    %c1_30 = arith.constant 1 : index
    %c0_31 = arith.constant 0 : index
    %34 = vector.load %arg10[%c1_30, %c0_31] : memref<119x32xbf16, #tpu.memory_space<vmem>>, vector<101x32xbf16>
    %c1_32 = arith.constant 1 : index
    %c0_33 = arith.constant 0 : index
    %c0_34 = arith.constant 0 : index
    %35 = vector.load %arg4[%c1_32, %c0_33, %c0_34] : memref<9x32x64xbf16, #tpu.memory_space<vmem>>, vector<1x32x64xbf16>
    %36 = vector.shape_cast %35 : vector<1x32x64xbf16> to vector<32x64xbf16>
    %cst_35 = arith.constant dense<0.000000e+00> : vector<101x64xf32>
    %37 = tpu.matmul %34, %36, %cst_35 {dimension_numbers = #tpu.dot_dimension_numbers<[1], [0], [0], [1], [0, 0, 1, 1], [], []>} : vector<101x32xbf16>, vector<32x64xbf16>, vector<101x64xf32> -> vector<101x64xf32>
    %38 = arith.addf %33, %37 : vector<101x64xf32>
    %c2_36 = arith.constant 2 : index
    %c0_37 = arith.constant 0 : index
    %39 = vector.load %arg10[%c2_36, %c0_37] : memref<119x32xbf16, #tpu.memory_space<vmem>>, vector<101x32xbf16>
    %c2_38 = arith.constant 2 : index
    %c0_39 = arith.constant 0 : index
    %c0_40 = arith.constant 0 : index
    %40 = vector.load %arg4[%c2_38, %c0_39, %c0_40] : memref<9x32x64xbf16, #tpu.memory_space<vmem>>, vector<1x32x64xbf16>
    %41 = vector.shape_cast %40 : vector<1x32x64xbf16> to vector<32x64xbf16>
    %cst_41 = arith.constant dense<0.000000e+00> : vector<101x64xf32>
    %42 = tpu.matmul %39, %41, %cst_41 {dimension_numbers = #tpu.dot_dimension_numbers<[1], [0], [0], [1], [0, 0, 1, 1], [], []>} : vector<101x32xbf16>, vector<32x64xbf16>, vector<101x64xf32> -> vector<101x64xf32>
    %43 = arith.addf %38, %42 : vector<101x64xf32>
    %c8_42 = arith.constant 8 : index
    %c0_43 = arith.constant 0 : index
    %44 = vector.load %arg10[%c8_42, %c0_43] : memref<119x32xbf16, #tpu.memory_space<vmem>>, vector<101x32xbf16>
    %c3_44 = arith.constant 3 : index
    %c0_45 = arith.constant 0 : index
    %c0_46 = arith.constant 0 : index
    %45 = vector.load %arg4[%c3_44, %c0_45, %c0_46] : memref<9x32x64xbf16, #tpu.memory_space<vmem>>, vector<1x32x64xbf16>
    %46 = vector.shape_cast %45 : vector<1x32x64xbf16> to vector<32x64xbf16>
    %cst_47 = arith.constant dense<0.000000e+00> : vector<101x64xf32>
    %47 = tpu.matmul %44, %46, %cst_47 {dimension_numbers = #tpu.dot_dimension_numbers<[1], [0], [0], [1], [0, 0, 1, 1], [], []>} : vector<101x32xbf16>, vector<32x64xbf16>, vector<101x64xf32> -> vector<101x64xf32>
    %48 = arith.addf %43, %47 : vector<101x64xf32>
    %c9_48 = arith.constant 9 : index
    %c0_49 = arith.constant 0 : index
    %49 = vector.load %arg10[%c9_48, %c0_49] : memref<119x32xbf16, #tpu.memory_space<vmem>>, vector<101x32xbf16>
    %c4 = arith.constant 4 : index
    %c0_50 = arith.constant 0 : index
    %c0_51 = arith.constant 0 : index
    %50 = vector.load %arg4[%c4, %c0_50, %c0_51] : memref<9x32x64xbf16, #tpu.memory_space<vmem>>, vector<1x32x64xbf16>
    %51 = vector.shape_cast %50 : vector<1x32x64xbf16> to vector<32x64xbf16>
    %cst_52 = arith.constant dense<0.000000e+00> : vector<101x64xf32>
    %52 = tpu.matmul %49, %51, %cst_52 {dimension_numbers = #tpu.dot_dimension_numbers<[1], [0], [0], [1], [0, 0, 1, 1], [], []>} : vector<101x32xbf16>, vector<32x64xbf16>, vector<101x64xf32> -> vector<101x64xf32>
    %53 = arith.addf %48, %52 : vector<101x64xf32>
    %c10 = arith.constant 10 : index
    %c0_53 = arith.constant 0 : index
    %54 = vector.load %arg10[%c10, %c0_53] : memref<119x32xbf16, #tpu.memory_space<vmem>>, vector<101x32xbf16>
    %c5 = arith.constant 5 : index
    %c0_54 = arith.constant 0 : index
    %c0_55 = arith.constant 0 : index
    %55 = vector.load %arg4[%c5, %c0_54, %c0_55] : memref<9x32x64xbf16, #tpu.memory_space<vmem>>, vector<1x32x64xbf16>
    %56 = vector.shape_cast %55 : vector<1x32x64xbf16> to vector<32x64xbf16>
    %cst_56 = arith.constant dense<0.000000e+00> : vector<101x64xf32>
    %57 = tpu.matmul %54, %56, %cst_56 {dimension_numbers = #tpu.dot_dimension_numbers<[1], [0], [0], [1], [0, 0, 1, 1], [], []>} : vector<101x32xbf16>, vector<32x64xbf16>, vector<101x64xf32> -> vector<101x64xf32>
    %58 = arith.addf %53, %57 : vector<101x64xf32>
    %c16 = arith.constant 16 : index
    %c0_57 = arith.constant 0 : index
    %59 = vector.load %arg10[%c16, %c0_57] : memref<119x32xbf16, #tpu.memory_space<vmem>>, vector<101x32xbf16>
    %c6 = arith.constant 6 : index
    %c0_58 = arith.constant 0 : index
    %c0_59 = arith.constant 0 : index
    %60 = vector.load %arg4[%c6, %c0_58, %c0_59] : memref<9x32x64xbf16, #tpu.memory_space<vmem>>, vector<1x32x64xbf16>
    %61 = vector.shape_cast %60 : vector<1x32x64xbf16> to vector<32x64xbf16>
    %cst_60 = arith.constant dense<0.000000e+00> : vector<101x64xf32>
    %62 = tpu.matmul %59, %61, %cst_60 {dimension_numbers = #tpu.dot_dimension_numbers<[1], [0], [0], [1], [0, 0, 1, 1], [], []>} : vector<101x32xbf16>, vector<32x64xbf16>, vector<101x64xf32> -> vector<101x64xf32>
    %63 = arith.addf %58, %62 : vector<101x64xf32>
    %c17 = arith.constant 17 : index
    %c0_61 = arith.constant 0 : index
    %64 = vector.load %arg10[%c17, %c0_61] : memref<119x32xbf16, #tpu.memory_space<vmem>>, vector<101x32xbf16>
    %c7 = arith.constant 7 : index
    %c0_62 = arith.constant 0 : index
    %c0_63 = arith.constant 0 : index
    %65 = vector.load %arg4[%c7, %c0_62, %c0_63] : memref<9x32x64xbf16, #tpu.memory_space<vmem>>, vector<1x32x64xbf16>
    %66 = vector.shape_cast %65 : vector<1x32x64xbf16> to vector<32x64xbf16>
    %cst_64 = arith.constant dense<0.000000e+00> : vector<101x64xf32>
    %67 = tpu.matmul %64, %66, %cst_64 {dimension_numbers = #tpu.dot_dimension_numbers<[1], [0], [0], [1], [0, 0, 1, 1], [], []>} : vector<101x32xbf16>, vector<32x64xbf16>, vector<101x64xf32> -> vector<101x64xf32>
    %68 = arith.addf %63, %67 : vector<101x64xf32>
    %c18 = arith.constant 18 : index
    %c0_65 = arith.constant 0 : index
    %69 = vector.load %arg10[%c18, %c0_65] : memref<119x32xbf16, #tpu.memory_space<vmem>>, vector<101x32xbf16>
    %c8_66 = arith.constant 8 : index
    %c0_67 = arith.constant 0 : index
    %c0_68 = arith.constant 0 : index
    %70 = vector.load %arg4[%c8_66, %c0_67, %c0_68] : memref<9x32x64xbf16, #tpu.memory_space<vmem>>, vector<1x32x64xbf16>
    %71 = vector.shape_cast %70 : vector<1x32x64xbf16> to vector<32x64xbf16>
    %cst_69 = arith.constant dense<0.000000e+00> : vector<101x64xf32>
    %72 = tpu.matmul %69, %71, %cst_69 {dimension_numbers = #tpu.dot_dimension_numbers<[1], [0], [0], [1], [0, 0, 1, 1], [], []>} : vector<101x32xbf16>, vector<32x64xbf16>, vector<101x64xf32> -> vector<101x64xf32>
    %73 = arith.addf %68, %72 : vector<101x64xf32>
    %c0_70 = arith.constant 0 : index
    %c0_71 = arith.constant 0 : index
    %74 = vector.load %arg5[%c0_70, %c0_71] : memref<1x64xf32, #tpu.memory_space<vmem>>, vector<1x64xf32>
    %75 = vector.broadcast %74 : vector<1x64xf32> to vector<101x64xf32>
    %76 = arith.addf %73, %75 : vector<101x64xf32>
    %cst_72 = arith.constant 0.000000e+00 : f32
    %77 = vector.broadcast %cst_72 : f32 to vector<101x64xf32>
    %78 = arith.maximumf %76, %77 : vector<101x64xf32>
    %79 = arith.truncf %78 : vector<101x64xf32> to vector<101x64xbf16>
    %c0_73 = arith.constant 0 : index
    %c0_74 = arith.constant 0 : index
    %80 = vector.load %arg6[%c0_73, %c0_74] : memref<2x101xbf16, #tpu.memory_space<vmem>>, vector<2x101xbf16>
    %cst_75 = arith.constant dense<0.000000e+00> : vector<2x64xf32>
    %81 = tpu.matmul %80, %79, %cst_75 {dimension_numbers = #tpu.dot_dimension_numbers<[1], [0], [0], [1], [0, 0, 1, 1], [], []>} : vector<2x101xbf16>, vector<101x64xbf16>, vector<2x64xf32> -> vector<2x64xf32>
    %cst_76 = arith.constant 4.000000e-02 : f32
    %82 = vector.broadcast %cst_76 : f32 to vector<2x64xf32>
    %83 = arith.mulf %81, %82 : vector<2x64xf32>
    %84 = arith.truncf %83 : vector<2x64xf32> to vector<2x64xbf16>
    %c0_77 = arith.constant 0 : index
    %c0_78 = arith.constant 0 : index
    %85 = vector.load %arg7[%c0_77, %c0_78] : memref<64x128xbf16, #tpu.memory_space<vmem>>, vector<64x128xbf16>
    %cst_79 = arith.constant dense<0.000000e+00> : vector<2x128xf32>
    %86 = tpu.matmul %84, %85, %cst_79 {dimension_numbers = #tpu.dot_dimension_numbers<[1], [0], [0], [1], [0, 0, 1, 1], [], []>} : vector<2x64xbf16>, vector<64x128xbf16>, vector<2x128xf32> -> vector<2x128xf32>
    %c0_80 = arith.constant 0 : index
    %c0_81 = arith.constant 0 : index
    %87 = vector.load %arg8[%c0_80, %c0_81] : memref<1x128xf32, #tpu.memory_space<vmem>>, vector<1x128xf32>
    %88 = vector.broadcast %87 : vector<1x128xf32> to vector<2x128xf32>
    %89 = arith.addf %86, %88 : vector<2x128xf32>
    %c0_82 = arith.constant 0 : index
    %c0_83 = arith.constant 0 : index
    %90 = vector.load %arg9[%c0_82, %c0_83] : memref<2x128xf32, #tpu.memory_space<vmem>>, vector<2x128xf32>
    tpu.vector_store %arg9[%c0_82, %c0_83], %89 {strides = array<i32>} : memref<2x128xf32, #tpu.memory_space<vmem>>, vector<2x128xf32>,
    return
  }
  func.func @transform_0(%arg0: i32) -> (i32, i32) {
    %c0_i32 = arith.constant 0 : i32
    %c0_i32_0 = arith.constant 0 : i32
    return %arg0, %c0_i32 : i32, i32
  }
  func.func @transform_1(%arg0: i32) -> (i32, i32, i32) {
    %c0_i32 = arith.constant 0 : i32
    %c0_i32_0 = arith.constant 0 : i32
    %c0_i32_1 = arith.constant 0 : i32
    %c0_i32_2 = arith.constant 0 : i32
    return %c0_i32, %c0_i32_0, %c0_i32_1 : i32, i32, i32
  }
  func.func @transform_2(%arg0: i32) -> (i32, i32) {
    %c0_i32 = arith.constant 0 : i32
    %c0_i32_0 = arith.constant 0 : i32
    %c0_i32_1 = arith.constant 0 : i32
    return %c0_i32, %c0_i32_0 : i32, i32
  }
  func.func @transform_3(%arg0: i32) -> (i32, i32, i32) {
    %c0_i32 = arith.constant 0 : i32
    %c0_i32_0 = arith.constant 0 : i32
    %c0_i32_1 = arith.constant 0 : i32
    %c0_i32_2 = arith.constant 0 : i32
    return %c0_i32, %c0_i32_0, %c0_i32_1 : i32, i32, i32
  }
  func.func @transform_4(%arg0: i32) -> (i32, i32) {
    %c0_i32 = arith.constant 0 : i32
    %c0_i32_0 = arith.constant 0 : i32
    %c0_i32_1 = arith.constant 0 : i32
    return %c0_i32, %c0_i32_0 : i32, i32
  }
  func.func @transform_5(%arg0: i32) -> (i32, i32) {
    %c0_i32 = arith.constant 0 : i32
    %c0_i32_0 = arith.constant 0 : i32
    %c0_i32_1 = arith.constant 0 : i32
    return %c0_i32, %c0_i32_0 : i32, i32
  }
  func.func @transform_6(%arg0: i32) -> (i32, i32) {
    %c0_i32 = arith.constant 0 : i32
    %c0_i32_0 = arith.constant 0 : i32
    %c0_i32_1 = arith.constant 0 : i32
    return %c0_i32, %c0_i32_0 : i32, i32
  }
  func.func @transform_7(%arg0: i32) -> (i32, i32) {
    %c0_i32 = arith.constant 0 : i32
    %c0_i32_0 = arith.constant 0 : i32
    %c0_i32_1 = arith.constant 0 : i32
    return %c0_i32, %c0_i32_0 : i32, i32
  }
  func.func @transform_8(%arg0: i32) -> (i32, i32) {
    %c0_i32 = arith.constant 0 : i32
    %c0_i32_0 = arith.constant 0 : i32
    return %arg0, %c0_i32 : i32, i32
  }
}

</mosaic_0001>

<bundles_post_ra>
// kernel: hair_classifier_forward.1
= control target key start
LH: loop header
LB: loop body
LE: loop exit
PB: predicated region body
PF: predicated region fallthrough
CT: control target
= control target key end

     0   :  { %vm89_vm0 = vsmask.f32 7424  ;;  %vm159_vm1 = vcmask 130048   ;;  %s4555_s0 = inlined_call_operand.vmem [shape: bf16[128,16], index: 0, kind: input, shape index: {}]   ;;  %s4556_s1 = inlined_call_operand.vmem [shape: bf16[4,16,32], index: 1, kind: input, shape index: {}]   ;;  %s4557_s2 = inlined_call_operand.vmem [shape: f32[1,32], index: 2, kind: input, shape index: {}]   ;;  %s4558_s3 = inlined_call_operand.vmem [shape: bf16[9,32,64], index: 3, kind: input, shape index: {}]   ;;  %s4559_s4 = inlined_call_operand.vmem [shape: f32[1,64], index: 4, kind: input, shape index: {}]   ;;  %s4560_s5 = inlined_call_operand.vmem [shape: bf16[2,101], index: 5, kind: input, shape index: {}]   ;;  %s4561_s6 = inlined_call_operand.vmem [shape: bf16[64,128], index: 6, kind: input, shape index: {}]   ;;  %s4562_s7 = inlined_call_operand.vmem [shape: f32[1,128], index: 7, kind: input, shape index: {}]   ;;  %s4563_s8 = inlined_call_operand.hbm [shape: f32[2,128], index: 8, kind: output, shape index: {}]  }
   0x1   :  { %v3477_v0 = vld [vmem:[%s4556_s1 + $0x8] sm:$0xff]   ;;  %v3625_v1 = vld [vmem:[%s4555_s0] sm:$0xff]   ;;  %v3635_v3 = vld [vmem:[%s4555_s0 + $0x10] sm:$0xff]  }
   0x2   :  { %3043 = vmatprep.subr.bf16.mxu0 %v3477_v0  ;;  %v3630_v2 = vld [vmem:[%s4555_s0 + $0x8] sm:$0xff]   ;;  %v91_v4 = vshrl.u32 %v3625_v1, 16  ;;  %v93_v5 = vshll.u32 %v3625_v1, 16  ;;  %v106_v8 = vshll.u32 %v3635_v3, 16  ;;  %v3481_v9 = vld [vmem:[%s4556_s1] sm:$0xff]   ;;  %v3482_v12 = vld [vmem:[%s4555_s0 + $0x18] sm:$0xff]  }
   0x3   :  { %3044 = vmatpush3.bf16.msra.mxu0 %v3477_v0  ;;  %v98_v6 = vshll.u32 %v3630_v2, 16  ;;  %v102_v7 = vshrl.u32 %v3630_v2, 16  ;;  %v110_v13 = vshrl.u32 %v3635_v3, 16  ;;  %v3483_v15 = vld [vmem:[%s4555_s0 + $0x20] sm:$0xff]   ;;  %v114_v18 = vshll.u32 %v3482_v12, 16  ;;  %v3484_v22 = vld [vmem:[%s4555_s0 + $0x28] sm:$0xff]  }
   0x4   :  { %v95_v10 = vrot.slane %v93_v5, 1  ;;  %v108_v14 = vrot.slane %v106_v8, 1  ;;  %3061 = vmatprep.subr.bf16.mxu0 %v3481_v9  ;;  %v118_v20 = vshrl.u32 %v3482_v12, 16  ;;  %v122_v21 = vshll.u32 %v3483_v15, 16  ;;  %v3487_v27 = vld [vmem:[%s4556_s1 + $0x10] sm:$0xff]  }
   0x5   :  { %v100_v11 = vrot.slane %v98_v6, 1  ;;  %v126_v23 = vshrl.u32 %v3483_v15, 16  ;;  %v116_v26 = vrot.slane %v114_v18, 1  ;;  %v130_v28 = vshll.u32 %v3484_v22, 16  ;;  %v3485_v29 = vld [vmem:[%s4555_s0 + $0x30] sm:$0xff]  }
   0x6   :  { %v96_v16 = vor.u32 %v95_v10, %v91_v4  ;;  %v112_v19 = vor.u32 %v110_v13, %v108_v14  ;;  %v124_v31 = vrot.slane %v122_v21, 1  ;;  %v3486_v33 = vld [vmem:[%s4555_s0 + $0x38] ss:$0 sps:$4 sm:$0xff]   ;;  %v138_v36 = vshll.u32 %v3485_v29, 16 }
   0x7   :  { %v104_v17 = vor.u32 %v102_v7, %v100_v11  ;;  %v120_v32 = vor.u32 %v118_v20, %v116_v26  ;;  %v132_v35 = vrot.slane %v130_v28, 1  ;;  %v134_v38 = vshrl.u32 %v3484_v22, 16 }
   0x8   :  { %v101_v24 = vsel %vm89_vm0, %v96_v16, %v100_v11  ;;  %v117_v30 = vsel %vm89_vm0, %v112_v19, %v116_v26  ;;  %v128_v34 = vor.u32 %v126_v23, %v124_v31  ;;  %v142_v40 = vshrl.u32 %v3485_v29, 16 }
   0x9   :  { %v109_v25 = vsel %vm89_vm0, %v104_v17, %v108_v14  ;;  %3045 = vmatprep.mubr.msk.bf16.mxu0 %vm159_vm1, %v101_v24  ;;  %v125_v37 = vsel %vm89_vm0, %v120_v32, %v124_v31  ;;  %v146_v41 = vshll.u32 %v3486_v33, 16  ;;  %v140_v42 = vrot.slane %v138_v36, 1 }
   0xa   :  { %3046 = vmatmul.mubr.msk.bf16.vlgmr.msra.gmra.mrb[0].mxu0 %vm159_vm1, %v109_v25  ;;  %v133_v39 = vsel %vm89_vm0, %v128_v34, %v132_v35  ;;  %v136_v43 = vor.u32 %v134_v38, %v132_v35  ;;  %v150_v48 = vshrl.u32 %v3486_v33, 16 }
   0xb   :  { %3062 = vmatpush3.bf16.msra.mxu0 %v3481_v9  ;;  %3049 = vmatprep.mubr.msk.bf16.mxu0 %vm159_vm1, %v117_v30  ;;  %v144_v44 = vor.u32 %v142_v40, %v140_v42  ;;  %v148_v45 = vrot.slane %v146_v41, 1 }
   0xc   :  { %3079 = vmatprep.subr.bf16.mxu0 %v3487_v27  ;;  %v141_v46 = vsel %vm89_vm0, %v136_v43, %v140_v42 }
   0xd   :  { %v149_v47 = vsel %vm89_vm0, %v144_v44, %v148_v45  ;;  %v152_v49 = vor.u32 %v150_v48, %v148_v45 }
  0x12   :  { %3050 = vmatmul.mubr.msk.bf16.gmra.mrb[4].mxu0 %vm159_vm1, %v125_v37 }
  0x13   :  { %3053 = vmatprep.mubr.msk.bf16.mxu0 %vm159_vm1, %v133_v39 }
  0x1a   :  { %3054 = vmatmul.mubr.msk.bf16.gmra.mrb[8].mxu0 %vm159_vm1, %v141_v46 }
  0x1b   :  { %3057 = vmatprep.mubr.msk.bf16.mxu0 %vm159_vm1, %v149_v47 }
  0x22   :  { %3058 = vmatmul.mubr.msk.bf16.gmra.mrb[12].mxu0 %vm159_vm1, %v152_v49 }
  0x23   :  { %3063 = vmatprep.mubr.msk.bf16.mxu0 %vm159_vm1, %v3625_v1 }
  0x24   :  { %13 = vsyncpa [#allocation4], 0  ;;  %v3490_v50 = vld [vmem:[%s4556_s1 + $0x18] sm:$0xff]   ;;  %v3488_v51 = vld [vmem:[%s4555_s0 + $0x4] sm:$0xff]   ;;  %v3570_v35 = vmov 0.0   ;;  %vm3571_vm2 = vmmov 0  }
  0x25   :  { %v3489_v52 = vld [vmem:[%s4555_s0 + $0xc] sm:$0xff]   ;;  %v3491_v53 = vld [vmem:[%s4555_s0 + $0x14] sm:$0xff]   ;;  %v3492_v54 = vld [vmem:[%s4555_s0 + $0x1c] sm:$0xff]   ;;  %v600_v56 = vshll.u32 %v3488_v51, 16  ;;  %v598_v59 = vshrl.u32 %v3488_v51, 16  ;;  %3433 = vmatprep.subr.bf16.mxu1 %v3570_v35  ;;  %3123 = vmatprep.mubr.msk.bf16.mxu1 %vm3571_vm2, %v3570_v35  ;;  %vm892_vm3 = vcmask 257024  }
  0x26   :  { %v3493_v55 = vld [vmem:[%s4555_s0 + $0x24] sm:$0xff]   ;;  %v3494_v57 = vld [vmem:[%s4555_s0 + $0x2c] sm:$0xff]   ;;  %v3495_v58 = vld [vmem:[%s4555_s0 + $0x34] sm:$0xff]   ;;  %v604_v61 = vshll.u32 %v3489_v52, 16  ;;  %v611_v0 = vshll.u32 %v3491_v53, 16  ;;  %v615_v4 = vshrl.u32 %v3491_v53, 16 }
  0x27   :  { %v602_v60 = vrot.slane %v600_v56, 1  ;;  %v3496_v1 = vld [vmem:[%s4555_s0 + $0x3c] ss:$0 sps:$4 sm:$0xff]   ;;  %v618_v5 = vshll.u32 %v3492_v54, 16  ;;  %v625_v10 = vshll.u32 %v3493_v55, 16  ;;  %v629_v14 = vshrl.u32 %v3493_v55, 16 }
  0x28   :  { %v606_v63 = vrot.slane %v604_v61, 1  ;;  %v613_v6 = vrot.slane %v611_v0, 1  ;;  %v639_v20 = vshll.u32 %v3495_v58, 16  ;;  %v643_v24 = vshrl.u32 %v3495_v58, 16  ;;  %v3497_v34 = vld [vmem:[%s4558_s3 + $0x10] sm:$0xff]   ;;  %v3498_v36 = vld [vmem:[%s4558_s3 + $0x18] sm:$0xff]  }
  0x29   :  { %v603_v62 = vor.u32 %v602_v60, %v598_v59  ;;  %v620_v9 = vrot.slane %v618_v5, 1  ;;  %v627_v16 = vrot.slane %v625_v10, 1  ;;  %v646_v25 = vshll.u32 %v3496_v1, 16  ;;  %3435 = vmatpush3.bf16.msra.mxu1 %v3497_v34  ;;  %s3573_s21 = smov [#allocation3]  }
  0x2a   :  { %3064 = vmatmul.mubr.msk.bf16.vlgmr.msra.gmra.mrb[0].mxu0 %vm159_vm1, %v3630_v2  ;;  %v608_v2 = vshrl.u32 %v3489_v52, 16  ;;  %v617_v8 = vor.u32 %v615_v4, %v613_v6  ;;  %v641_v26 = vrot.slane %v639_v20, 1  ;;  %v650_v32 = vshrl.u32 %v3496_v1, 16  ;;  %3434 = vmatprep.subr.bf16.mxu1 %v3570_v35  ;;  %s2668_s0 = sshll.u32 %s3573_s21, 4  ;;  %s2669_s0 = int_to_ptr.vmem [resolvable:$true] %s2668_s0 }
  0x2b   :  { %3080 = vmatpush3.bf16.msra.mxu0 %v3487_v27  ;;  %3067 = vmatprep.mubr.msk.bf16.mxu0 %vm159_vm1, %v3635_v3  ;;  %v607_v3 = vsel %vm89_vm0, %v603_v62, %v606_v63  ;;  %v631_v18 = vor.u32 %v629_v14, %v627_v16  ;;  %vm1035_vm4 = vcmask 261120   ;;  %vm908_vm5 = vsmask.f32 3328  ;;  %p3551_p1 = scmp.lt.s32.totalorder %s2669_s0, %s2669_s0 }
  0x2c   :  { %3097 = vmatprep.subr.bf16.mxu0 %v3490_v50  ;;  %v610_v7 = vor.u32 %v608_v2, %v606_v63  ;;  %v621_v13 = vsel %vm89_vm0, %v617_v8, %v620_v9  ;;  %v645_v28 = vor.u32 %v643_v24, %v641_v26  ;;  %vm3828_vm6 = vmand %vm892_vm3, %vm908_vm5  ;;  %vm1272_vm7 = vcmask 1046528  }
  0x2d   :  { %3436 = vmatpush3.bf16.msra.mxu1 %v3498_v36  ;;  %vm2529_vm8 = vcmask 1041408   ;;  %vm2530_vm9 = vcmask 1042432   ;;  %vm2525_vm10 = vcmask 826368   ;;  %vm2617_vm11 = vcmask 523264  }
  0x2e   :  { %v614_v11 = vsel %vm89_vm0, %v610_v7, %v613_v6  ;;  %3147 = vmatprep.subr.bf16.mxu1 %v3570_v35 }
  0x32   :  { %3068 = vmatmul.mubr.msk.bf16.gmra.mrb[4].mxu0 %vm159_vm1, %v3482_v12  ;;  %v622_v12 = vshrl.u32 %v3492_v54, 16 }
  0x33   :  { %3071 = vmatprep.mubr.msk.bf16.mxu0 %vm159_vm1, %v3483_v15  ;;  %v632_v15 = vshll.u32 %v3494_v57, 16 }
  0x34   :  { %v624_v17 = vor.u32 %v622_v12, %v620_v9 }
  0x35   :  { %v634_v19 = vrot.slane %v632_v15, 1 }
  0x36   :  { %v628_v21 = vsel %vm89_vm0, %v624_v17, %v627_v16 }
  0x37   :  { %v635_v23 = vsel %vm89_vm0, %v631_v18, %v634_v19 }
  0x3a   :  { %3072 = vmatmul.mubr.msk.bf16.gmra.mrb[8].mxu0 %vm159_vm1, %v3484_v22  ;;  %v636_v22 = vshrl.u32 %v3494_v57, 16 }
  0x3b   :  { %3075 = vmatprep.mubr.msk.bf16.mxu0 %vm159_vm1, %v3485_v29  ;;  %v648_v29 = vrot.slane %v646_v25, 1 }
  0x3c   :  { %v638_v27 = vor.u32 %v636_v22, %v634_v19 }
  0x3d   :  { %v649_v31 = vsel %vm89_vm0, %v645_v28, %v648_v29 }
  0x3e   :  { %v642_v30 = vsel %vm89_vm0, %v638_v27, %v641_v26 }
  0x42   :  { %3076 = vmatmul.mubr.msk.bf16.gmra.mrb[16].mxu0 %vm159_vm1, %v3486_v33  ;;  %v652_v33 = vor.u32 %v650_v32, %v648_v29 }
  0x43   :  { %3081 = vmatprep.mubr.msk.bf16.mxu0 %vm159_vm1, %v3488_v51 }
  0x4a   :  { %3082 = vmatmul.mubr.msk.bf16.vlgmr.msra.gmra.mrb[0].mxu0 %vm159_vm1, %v3489_v52 }
  0x4b   :  { %3098 = vmatpush3.bf16.msra.mxu0 %v3490_v50  ;;  %3085 = vmatprep.mubr.msk.bf16.mxu0 %vm159_vm1, %v3491_v53 }
  0x4c   :  { %3115 = vmatprep.subr.bf16.mxu0 %v3570_v35 }
  0x52   :  { %3086 = vmatmul.mubr.msk.bf16.gmra.mrb[4].mxu0 %vm159_vm1, %v3492_v54 }
  0x53   :  { %3089 = vmatprep.mubr.msk.bf16.mxu0 %vm159_vm1, %v3493_v55  ;;  %v3765_v55 = vld [vmem:[%s4557_s2] ss:$0 sm:$0xff] }
  0x5a   :  { %3090 = vmatmul.mubr.msk.bf16.gmra.mrb[8].mxu0 %vm159_vm1, %v3494_v57 }
  0x5b   :  { %3093 = vmatprep.mubr.msk.bf16.mxu0 %vm159_vm1, %v3495_v58 }
  0x62   :  { %3094 = vmatmul.mubr.msk.bf16.gmra.mrb[20].mxu0 %vm159_vm1, %v3496_v1 }
  0x63   :  { %3099 = vmatprep.mubr.msk.bf16.mxu0 %vm159_vm1, %v607_v3 }
  0x6a   :  { %3100 = vmatmul.mubr.msk.bf16.vlgmr.msra.gmra.mrb[0].mxu0 %vm159_vm1, %v614_v11 }
  0x6b   :  { %3103 = vmatprep.mubr.msk.bf16.mxu0 %vm159_vm1, %v621_v13  ;;  %3116 = vmatpush3.bf16.msra.mxu0 %v3497_v34 }
  0x6c   :  { %3117 = vmatprep.subr.bf16.mxu0 %v3570_v35 }
  0x6f   :  { %3118 = vmatpush3.bf16.msra.mxu0 %v3498_v36 }
  0x70   :  { %3211 = vmatprep.subr.bf16.mxu0 %v3570_v35 }
  0x72   :  { %3104 = vmatmul.mubr.msk.bf16.gmra.mrb[4].mxu0 %vm159_vm1, %v628_v21 }
  0x73   :  { %3107 = vmatprep.mubr.msk.bf16.mxu0 %vm159_vm1, %v635_v23 }
  0x7a   :  { %3108 = vmatmul.mubr.msk.bf16.gmra.mrb[8].mxu0 %vm159_vm1, %v642_v30 }
  0x7b   :  { %3111 = vmatprep.mubr.msk.bf16.mxu0 %vm159_vm1, %v649_v31 }
  0x82   :  { %3112 = vmatmul.mubr.msk.bf16.gmra.mrb[24].mxu0 %vm159_vm1, %v652_v33 }
  0x83   :  { %3119 = vmatprep.mubr.msk.bf16.mxu0 %vm3571_vm2, %v3570_v35 }
  0xf5   :  { %v3059_v37 = vpop.f32.mrb[12].mxu0 }
  0xf6   :  { %v266_v38 = vpop.f32.mrb[13].mxu0 }
  0xf7   :  { %v3060_v39 = vpop.f32.mrb[14].mxu0 }
  0xf8   :  { %v269_v40 = vpop.f32.mrb[15].mxu0 }
 0x115   :  { %v3077_v41 = vpop.f32.mrb[16].mxu0 }
 0x116   :  { %v393_v42 = vadd.f32 %v3077_v41, %v3059_v37  ;;  %v384_v43 = vpop.f32.mrb[17].mxu0 }
 0x117   :  { %v385_v44 = vadd.f32 %v384_v43, %v266_v38  ;;  %v3078_v45 = vpop.f32.mrb[18].mxu0 }
 0x118   :  { %v387_v46 = vpop.f32.mrb[19].mxu0 }
 0x119   :  { %v388_v47 = vadd.f32 %v387_v46, %v269_v40 }
 0x135   :  { %v3095_v48 = vpop.f32.mrb[20].mxu0 }
 0x136   :  { %v3756_v49 = vadd.f32 %v3095_v48, %v393_v42  ;;  %v566_v50 = vpop.f32.mrb[21].mxu0  ;;  %v3501_v48 = vld [vmem:[%s4558_s3 + $0x30] sm:$0xff]  }
 0x137   :  { %v3758_v51 = vadd.f32 %v566_v50, %v385_v44  ;;  %v3096_v52 = vpop.f32.mrb[22].mxu0 }
 0x138   :  { %v569_v53 = vpop.f32.mrb[23].mxu0 }
 0x139   :  { %v3760_v54 = vadd.f32 %v569_v53, %v388_v47 }
 0x13d   :  { %v3101_v56 = vpop.f32.mrb[0].mxu0 }
 0x13e   :  { %v803_v57 = vadd.f32 %v3101_v56, %v3765_v55  ;;  %v717_v58 = vpop.f32.mrb[1].mxu0 }
 0x13f   :  { %v801_v59 = vadd.f32 %v3765_v55, %v717_v58  ;;  %v3102_v60 = vpop.f32.mrb[2].mxu0 }
 0x140   :  { %v818_v61 = vmax.f32 %v803_v57, 0.0  ;;  %v804_v62 = vadd.f32 %v3102_v60, %v3765_v55  ;;  %v720_v63 = vpop.f32.mrb[3].mxu0 }
 0x141   :  { %v816_v0 = vmax.f32 %v801_v59, 0.0  ;;  %v802_v1 = vadd.f32 %v3765_v55, %v720_v63 }
 0x142   :  { %v2900_v2 = vpack.c.bf16 %v818_v61, %v818_v61  ;;  %v819_v3 = vmax.f32 %v804_v62, 0.0 }
 0x143   :  { %v2898_v4 = vpack.c.bf16 %v816_v0, %v816_v0  ;;  %v817_v5 = vmax.f32 %v802_v1, 0.0 }
 0x144   :  { %895 = vst.msk [vmem:[#allocation2 + $0x8] sm:$0xf] %vm892_vm3, %v2900_v2  ;;  %v2901_v6 = vpack.c.bf16 %v819_v3, %v819_v3  ;;  %v910_v2 = vld [vmem:[#allocation2 + $0x38] sm:$0xf] }
 0x145   :  { %893 = vst.msk [vmem:[#allocation2] sm:$0xf] %vm892_vm3, %v2898_v4  ;;  %v2899_v7 = vpack.c.bf16 %v817_v5, %v817_v5  ;;  %v3105_v8 = vpop.f32.mrb[4].mxu0 }
 0x146   :  { %896 = vst.msk [vmem:[#allocation2 + $0xc] sm:$0xf] %vm892_vm3, %v2901_v6  ;;  %v807_v9 = vadd.f32 %v3105_v8, %v3765_v55  ;;  %v733_v10 = vpop.f32.mrb[5].mxu0 }
 0x147   :  { %894 = vst.msk [vmem:[#allocation2 + $0x4] sm:$0xf] %vm892_vm3, %v2899_v7  ;;  %v805_v11 = vadd.f32 %v3765_v55, %v733_v10  ;;  %v3106_v12 = vpop.f32.mrb[6].mxu0 }
 0x148   :  { %v822_v13 = vmax.f32 %v807_v9, 0.0  ;;  %v808_v14 = vadd.f32 %v3106_v12, %v3765_v55  ;;  %v736_v15 = vpop.f32.mrb[7].mxu0  ;;  %v3505_v9 = vld [vmem:[%s4558_s3] sm:$0xff]  }
 0x149   :  { %v820_v16 = vmax.f32 %v805_v11, 0.0  ;;  %v806_v17 = vadd.f32 %v3765_v55, %v736_v15 }
 0x14a   :  { %v2904_v18 = vpack.c.bf16 %v822_v13, %v822_v13  ;;  %v823_v19 = vmax.f32 %v808_v14, 0.0 }
 0x14b   :  { %v2902_v20 = vpack.c.bf16 %v820_v16, %v820_v16  ;;  %v821_v21 = vmax.f32 %v806_v17, 0.0  ;;  %v3834_v15 = vld [vmem:[#allocation2 + $0x8] sm:$0xf] }
 0x14c   :  { %899 = vst.msk [vmem:[#allocation2 + $0x18] sm:$0xf] %vm892_vm3, %v2904_v18  ;;  %v2905_v22 = vpack.c.bf16 %v823_v19, %v823_v19  ;;  %v913_v28 = vld [vmem:[#allocation2] sm:$0xf]  ;;  %v3512_v16 = vld [vmem:[%s4558_s3 + $0x8] sm:$0xff]   ;;  %v3517_v19 = vld [vmem:[%s4558_s3 + $0x50] sm:$0xff]  }
 0x14d   :  { %897 = vst.msk [vmem:[#allocation2 + $0x10] sm:$0xf] %vm892_vm3, %v2902_v20  ;;  %v2903_v23 = vpack.c.bf16 %v821_v21, %v821_v21  ;;  %v3109_v24 = vpop.f32.mrb[8].mxu0  ;;  %v3781_v25 = vld [vmem:[#allocation2 + $0x8] sm:$0xff]  }
 0x14e   :  { %900 = vst.msk [vmem:[#allocation2 + $0x1c] sm:$0xf] %vm892_vm3, %v2905_v22  ;;  %v811_v26 = vadd.f32 %v3109_v24, %v3765_v55  ;;  %v749_v27 = vpop.f32.mrb[9].mxu0  ;;  %v3785_v29 = vld [vmem:[#allocation2 + $0x4] sm:$0xf]  ;;  %v976_v40 = vshll.u32 %v3781_v25, 16 }
 0x14f   :  { %898 = vst.msk [vmem:[#allocation2 + $0x14] sm:$0xf] %vm892_vm3, %v2903_v23  ;;  %v809_v30 = vadd.f32 %v3765_v55, %v749_v27  ;;  %v3110_v31 = vpop.f32.mrb[10].mxu0  ;;  %v3790_v32 = vcombine.low %v913_v28, %v3785_v29  ;;  %v980_v1 = vshrl.u32 %v3781_v25, 16  ;;  %v1420_v5 = vld [vmem:[#allocation2 + $0x4] sm:$0xf] }
 0x150   :  { %v826_v33 = vmax.f32 %v811_v26, 0.0  ;;  %v812_v34 = vadd.f32 %v3110_v31, %v3765_v55  ;;  %v752_v36 = vpop.f32.mrb[11].mxu0  ;;  %v978_v56 = vrot.slane %v976_v40, 1  ;;  %v2798_v20 = vcombine.low %v1420_v5, %v3834_v15  ;;  %v3519_v27 = vld [vmem:[%s4558_s3 + $0x58] sm:$0xff]  }
 0x151   :  { %v824_v37 = vmax.f32 %v809_v30, 0.0  ;;  %v810_v38 = vadd.f32 %v3765_v55, %v752_v36  ;;  %v971_v39 = vshll.u32 %v3790_v32, 16  ;;  %v969_v43 = vshrl.u32 %v3790_v32, 16 }
 0x152   :  { %v2908_v41 = vpack.c.bf16 %v826_v33, %v826_v33  ;;  %v827_v42 = vmax.f32 %v812_v34, 0.0  ;;  %v982_v7 = vor.u32 %v980_v1, %v978_v56 }
 0x153   :  { %v2906_v44 = vpack.c.bf16 %v824_v37, %v824_v37  ;;  %v825_v45 = vmax.f32 %v810_v38, 0.0  ;;  %v973_v46 = vrot.slane %v971_v39, 1 }
 0x154   :  { %903 = vst.msk [vmem:[#allocation2 + $0x28] sm:$0xf] %vm892_vm3, %v2908_v41  ;;  %v2909_v47 = vpack.c.bf16 %v827_v42, %v827_v42  ;;  %v3867_v33 = vld [vmem:[#allocation2 + $0xc] sm:$0xff]  }
 0x155   :  { %901 = vst.msk [vmem:[#allocation2 + $0x20] sm:$0xf] %vm892_vm3, %v2906_v44  ;;  %v2907_v50 = vpack.c.bf16 %v825_v45, %v825_v45  ;;  %v3113_v52 = vpop.f32.mrb[24].mxu0  ;;  %v974_v53 = vor.u32 %v973_v46, %v969_v43  ;;  %v3824_v10 = vld [vmem:[#allocation2 + $0x18] sm:$0xff]   ;;  %v3885_v43 = vld [vmem:[#allocation2 + $0xc] sm:$0xf] }
 0x156   :  { %904 = vst.msk [vmem:[#allocation2 + $0x2c] sm:$0xf] %vm892_vm3, %v2909_v47  ;;  %v793_v57 = vadd.f32 %v3113_v52, %v3756_v49  ;;  %v765_v58 = vpop.f32.mrb[25].mxu0  ;;  %v3804_v59 = vld [vmem:[#allocation2 + $0x10] sm:$0xff]   ;;  %v992_v22 = vshll.u32 %v3824_v10, 16  ;;  %v996_v34 = vshrl.u32 %v3824_v10, 16 }
 0x157   :  { %902 = vst.msk [vmem:[#allocation2 + $0x24] sm:$0xf] %vm892_vm3, %v2907_v50  ;;  %v791_v60 = vadd.f32 %v765_v58, %v3758_v51  ;;  %v3114_v61 = vpop.f32.mrb[26].mxu0  ;;  %v979_v62 = vsel %vm89_vm0, %v974_v53, %v978_v56  ;;  %v984_v49 = vshll.u32 %v3804_v59, 16  ;;  %v3502_v51 = vld [vmem:[%s4558_s3 + $0x38] sm:$0xff]   ;;  %v988_v21 = vshrl.u32 %v3804_v59, 16 }
 0x158   :  { %v815_v63 = vadd.f32 %v3765_v55, %v793_v57  ;;  %v768_v0 = vpop.f32.mrb[27].mxu0  ;;  %3120 = vmatmul.mubr.msk.bf16.vlgmr.msra.gmra.mrb[28].mxu0 %vm1035_vm4, %v979_v62  ;;  %v994_v28 = vrot.slane %v992_v22, 1  ;;  %v3881_v40 = vld [vmem:[#allocation2 + $0x14] sm:$0xff]   ;;  %v1612_v45 = vshll.u32 %v2798_v20, 16  ;;  %v1610_v50 = vshrl.u32 %v2798_v20, 16 }
 0x159   :  { %v813_v3 = vadd.f32 %v3765_v55, %v791_v60  ;;  %v792_v4 = vadd.f32 %v768_v0, %v3760_v54  ;;  %3212 = vmatpush3.bf16.msra.mxu0 %v3501_v48  ;;  %3215 = vmatprep.mubr.msk.bf16.mxu0 %vm3571_vm2, %v3570_v35  ;;  %v986_v8 = vrot.slane %v984_v49, 1  ;;  %v1616_v53 = vshll.u32 %v3867_v33, 16  ;;  %v2324_v56 = vld [vmem:[#allocation2 + $0x8] sm:$0xe] }
 0x15a   :  { %v830_v6 = vmax.f32 %v815_v63, 0.0  ;;  %3213 = vmatprep.subr.bf16.mxu0 %v3570_v35  ;;  %v998_v38 = vor.u32 %v996_v34, %v994_v28  ;;  %v1614_v52 = vrot.slane %v1612_v45, 1  ;;  %v1623_v61 = vshll.u32 %v3881_v40, 16 }
 0x15b   :  { %v828_v11 = vmax.f32 %v813_v3, 0.0  ;;  %v814_v12 = vadd.f32 %v3765_v55, %v792_v4  ;;  %v987_v14 = vsel %vm89_vm0, %v982_v7, %v986_v8  ;;  %v990_v24 = vor.u32 %v988_v21, %v986_v8  ;;  %v3913_v7 = vld [vmem:[#allocation2 + $0x10] sm:$0xff]  }
 0x15c   :  { %v2912_v13 = vpack.c.bf16 %v830_v6, %v830_v6  ;;  %3124 = vmatmul.mubr.msk.bf16.vlgmr.msra.gmra.mrb[0].mxu1 %vm1035_vm4, %v987_v14  ;;  %v3891_v46 = vld [vmem:[#allocation2 + $0x1c] sm:$0xff]   ;;  %v2879_v62 = vcombine.low %v2324_v56, %v3885_v43  ;;  %v1615_v1 = vor.u32 %v1614_v52, %v1610_v50  ;;  %v1618_v49 = vrot.slane %v1616_v53, 1  ;;  %v1792_v50 = vld [vmem:[#allocation2 + $0x4] sm:$0xe]  ;;  %v3521_v52 = vld [vmem:[%s4558_s3 + $0x28] sm:$0xff]  }
 0x15d   :  { %v2910_v17 = vpack.c.bf16 %v828_v11, %v828_v11  ;;  %v829_v18 = vmax.f32 %v814_v12, 0.0  ;;  %3214 = vmatpush3.bf16.msra.mxu0 %v3502_v51  ;;  %3148 = vmatpush3.bf16.msra.mxu1 %v3505_v9  ;;  %v995_v30 = vsel %vm89_vm0, %v990_v24, %v994_v28  ;;  %v3877_v37 = vld [vmem:[#allocation2 + $0x28] sm:$0xff]   ;;  %v1625_v3 = vrot.slane %v1623_v61, 1 }
 0x15e   :  { %v911_v55 = vsel %vm3828_vm6, %v2912_v13, %v910_v2  ;;  %3127 = vmatprep.mubr.msk.bf16.mxu1 %vm3571_vm2, %v3570_v35  ;;  %3149 = vmatprep.subr.bf16.mxu1 %v3570_v35  ;;  %v3854_v26 = vld [vmem:[#allocation2 + $0x20] sm:$0xff]   ;;  %v1008_v42 = vshll.u32 %v3877_v37, 16  ;;  %v1012_v58 = vshrl.u32 %v3877_v37, 16  ;;  %v1620_v2 = vshrl.u32 %v3867_v33, 16 }
 0x15f   :  { %912 = vst [vmem:[#allocation2 + $0x38] sm:$0xf] %v911_v55  ;;  %905 = vst.msk [vmem:[#allocation2 + $0x30] sm:$0xf] %vm892_vm3, %v2910_v17  ;;  %v2911_v23 = vpack.c.bf16 %v829_v18, %v829_v18  ;;  %3275 = vmatprep.subr.bf16.mxu0 %v3570_v35  ;;  %v1000_v31 = vshll.u32 %v3854_v26, 16  ;;  %v1004_v41 = vshrl.u32 %v3854_v26, 16  ;;  %v3916_v8 = vsel %vm89_vm0, %v1615_v1, %v1618_v49 }
 0x160   :  { %3216 = vmatmul.mubr.msk.bf16.vlgmr.msra.gmra.mrb[32].mxu0 %vm1035_vm4, %v2798_v20  ;;  %v3893_v47 = vld [vmem:[#allocation2 + $0x24] sm:$0xff]   ;;  %v1010_v57 = vrot.slane %v1008_v42, 1  ;;  %v1627_v4 = vshrl.u32 %v3881_v40, 16  ;;  %v1630_v51 = vshll.u32 %v3891_v46, 16  ;;  %v1622_v9 = vor.u32 %v1620_v2, %v1618_v49 }
 0x161   :  { %906 = vst.msk [vmem:[#allocation2 + $0x34] sm:$0xf] %vm892_vm3, %v2911_v23  ;;  %3219 = vmatprep.mubr.msk.bf16.mxu0 %vm3571_vm2, %v3570_v35  ;;  %3276 = vmatpush3.bf16.msra.mxu0 %v3517_v19  ;;  %v1002_v36 = vrot.slane %v1000_v31, 1  ;;  %v1637_v5 = vshll.u32 %v3893_v47, 16  ;;  %v1634_v54 = vshrl.u32 %v3891_v46, 16  ;;  %v1641_v14 = vshrl.u32 %v3893_v47, 16 }
 0x162   :  { %3150 = vmatpush3.bf16.msra.mxu1 %v3512_v16  ;;  %3277 = vmatprep.subr.bf16.mxu0 %v3570_v35  ;;  %v1629_v11 = vor.u32 %v1627_v4, %v1625_v3  ;;  %v1632_v12 = vrot.slane %v1630_v51, 1  ;;  %v3924_v17 = vsel %vm89_vm0, %v1622_v9, %v1625_v3  ;;  %v2338_v28 = vrot.slane %v3913_v7, 1  ;;  %v1259_v3 = vld [vmem:[#allocation2] sm:$0xe] }
 0x163   :  { %3179 = vmatprep.subr.bf16.mxu1 %v3570_v35  ;;  %v1003_v39 = vsel %vm89_vm0, %v998_v38, %v1002_v36  ;;  %v1006_v48 = vor.u32 %v1004_v41, %v1002_v36  ;;  %v1639_v13 = vrot.slane %v1637_v5, 1  ;;  %v1014_v31 = vor.u32 %v1012_v58, %v1010_v57  ;;  %v1952_v5 = vld [vmem:[#allocation2 + $0x8] sm:$0xf] }
 0x164   :  { %3128 = vmatmul.mubr.msk.bf16.gmra.mrb[4].mxu1 %vm1035_vm4, %v995_v30  ;;  %v3929_v55 = vsel %vm89_vm0, %v1629_v11, %v1632_v12  ;;  %v1636_v20 = vor.u32 %v1634_v54, %v1632_v12  ;;  %v2831_v53 = vcombine.low %v1792_v50, %v3834_v15  ;;  %v3526_v15 = vld [vmem:[%s4558_s3 + $0x78] sm:$0xff]   ;;  %v2783_v4 = vcombine.low %v1259_v3, %v3785_v29 }
 0x165   :  { %3278 = vmatpush3.bf16.msra.mxu0 %v3519_v27  ;;  %3131 = vmatprep.mubr.msk.bf16.mxu1 %vm3571_vm2, %v3570_v35  ;;  %v1011_v6 = vsel %vm89_vm0, %v1006_v48, %v1010_v57  ;;  %v1643_v21 = vor.u32 %v1641_v14, %v1639_v13  ;;  %v2337_v27 = vrot.slane %v2879_v62, 1  ;;  %v3518_v48 = vld [vmem:[%s4558_s3 + $0x20] sm:$0xff]   ;;  %v3524_v57 = vld [vmem:[%s4558_s3 + $0x70] sm:$0xff]   ;;  %v1810_v62 = vrot.slane %v3891_v46, 1 }
 0x166   :  { %3339 = vmatprep.subr.bf16.mxu0 %v3570_v35  ;;  %v3889_v44 = vld [vmem:[#allocation2 + $0x30] ss:$0 sps:$4 sm:$0x77]   ;;  %v3940_v30 = vsel %vm89_vm0, %v1636_v20, %v1639_v13  ;;  %v1805_v56 = vrot.slane %v2831_v53, 1  ;;  %v1273_v51 = vrot.slane %v2783_v4, 1  ;;  %v1274_v29 = vrot.slane %v3781_v25, 1 }
 0x167   :  { %v3901_v60 = vld [vmem:[#allocation2 + $0x2c] sm:$0xff]   ;;  %v1016_v63 = vshll.u32 %v3889_v44, 16  ;;  %v3948_v38 = vsel %vm1272_vm7, %v2337_v27, %v2338_v28  ;;  %v1020_v42 = vshrl.u32 %v3889_v44, 16  ;;  %v1276_v11 = vrot.slane %v3804_v59, 1  ;;  %v4085_v27 = vld [vmem:[#allocation2 + $0x20] sm:$0xff]  }
 0x168   :  { %3220 = vmatmul.mubr.msk.bf16.gmra.mrb[36].mxu0 %vm1035_vm4, %v3867_v33  ;;  %v3906_v0 = vld [vmem:[#allocation2 + $0x34] ss:$0 sps:$4 sm:$0x77]   ;;  %v1644_v18 = vshll.u32 %v3901_v60, 16  ;;  %v1648_v22 = vshrl.u32 %v3901_v60, 16  ;;  %v1814_v1 = vrot.slane %v3901_v60, 1  ;;  %v1275_v9 = vsel %vm1272_vm7, %v1273_v51, %v1274_v29 }
 0x169   :  { %3223 = vmatprep.mubr.msk.bf16.mxu0 %vm3571_vm2, %v3570_v35  ;;  %v1018_v16 = vrot.slane %v1016_v63, 1  ;;  %v1651_v19 = vshll.u32 %v3906_v0, 16  ;;  %v1812_v63 = vrot.slane %v3893_v47, 1  ;;  %v3522_v49 = vld [vmem:[#allocation2 + $0x34] ss:$0 sps:$4 sm:$0xff]   ;;  %v1278_v20 = vrot.slane %v3824_v10, 1 }
 0x16a   :  { %v1646_v23 = vrot.slane %v1644_v18, 1  ;;  %v1816_v2 = vrot.slane %v3522_v49, 1  ;;  %v4100_v53 = vld [vmem:[#allocation2 + $0x28] sm:$0xff]  }
 0x16b   :  { %v3934_v24 = vrot.slane %v1651_v19, 1  ;;  %v1022_v45 = vor.u32 %v1020_v42, %v1018_v16  ;;  %v4074_v19 = vld [vmem:[#allocation2 + $0x18] sm:$0xff]   ;;  %v1280_v42 = vrot.slane %v3854_v26, 1 }
 0x16c   :  { %3132 = vmatmul.mubr.msk.bf16.gmra.mrb[8].mxu1 %vm1035_vm4, %v1003_v39  ;;  %v3943_v34 = vsel %vm89_vm0, %v1643_v21, %v1646_v23  ;;  %v1650_v36 = vor.u32 %v1648_v22, %v1646_v23  ;;  %v1019_v39 = vsel %vm89_vm0, %v1014_v31, %v1018_v16  ;;  %v1277_v16 = vsel %vm1272_vm7, %v1274_v29, %v1276_v11 }
 0x16d   :  { %3135 = vmatprep.mubr.msk.bf16.mxu1 %vm3571_vm2, %v3570_v35  ;;  %v2152_v21 = vshrl.u32 %v3913_v7, 16  ;;  %v2155_v22 = vshll.u32 %v4074_v19, 16  ;;  %v1279_v31 = vsel %vm1272_vm7, %v1276_v11, %v1278_v20  ;;  %v1281_v50 = vsel %vm1272_vm7, %v1278_v20, %v1280_v42 }
 0x16e   :  { %v3953_v41 = vsel %vm89_vm0, %v1650_v36, %v3934_v24 }
 0x16f   :  { %v2157_v36 = vrot.slane %v2155_v22, 1 }
 0x170   :  { %3224 = vmatmul.mubr.msk.bf16.gmra.mrb[40].mxu0 %vm1035_vm4, %v3881_v40 }
 0x171   :  { %3227 = vmatprep.mubr.msk.bf16.mxu0 %vm3571_vm2, %v3570_v35 }
 0x174   :  { %3136 = vmatmul.mubr.msk.bf16.gmra.mrb[12].mxu1 %vm1035_vm4, %v1011_v6  ;;  %v4050_v6 = vcombine.low %v1952_v5, %v3885_v43  ;;  %v3531_v43 = vld [vmem:[%s4558_s3 + $0x48] sm:$0xff]  }
 0x175   :  { %3139 = vmatprep.mubr.msk.bf16.mxu1 %vm3571_vm2, %v3570_v35 }
 0x176   :  { %v2144_v54 = vshll.u32 %v4050_v6, 16  ;;  %v2142_v13 = vshrl.u32 %v4050_v6, 16 }
 0x178   :  { %3228 = vmatmul.mubr.msk.bf16.gmra.mrb[44].mxu0 %vm1035_vm4, %v3891_v46  ;;  %v1813_v46 = vsel %vm1272_vm7, %v1810_v62, %v1812_v63  ;;  %v2146_v12 = vrot.slane %v2144_v54, 1 }
 0x179   :  { %3231 = vmatprep.mubr.msk.bf16.mxu0 %vm3571_vm2, %v3570_v35 }
 0x17a   :  { %v2147_v18 = vor.u32 %v2146_v12, %v2142_v13 }
 0x17c   :  { %3140 = vmatmul.mubr.msk.bf16.gmra.mrb[16].mxu1 %vm1035_vm4, %v1019_v39  ;;  %v2162_v39 = vshll.u32 %v4085_v27, 16 }
 0x17d   :  { %3143 = vmatprep.mubr.msk.bf16.mxu1 %vm3571_vm2, %v3570_v35 }
 0x180   :  { %3232 = vmatmul.mubr.msk.bf16.gmra.mrb[48].mxu0 %vm1035_vm4, %v3893_v47  ;;  %v1815_v47 = vsel %vm1272_vm7, %v1812_v63, %v1814_v1 }
 0x181   :  { %3235 = vmatprep.mubr.msk.bf16.mxu0 %vm3571_vm2, %v3570_v35 }
 0x184   :  { %3144 = vmatmul.mubr.msk.bf16.gmra.mrb[20].mxu1 %vm1035_vm4, %v1022_v45  ;;  %v2159_v45 = vshrl.u32 %v4074_v19, 16 }
 0x185   :  { %3151 = vmatprep.mubr.msk.bf16.mxu1 %vm3571_vm2, %v3570_v35 }
 0x188   :  { %3236 = vmatmul.mubr.msk.bf16.gmra.mrb[52].mxu0 %vm1035_vm4, %v3901_v60  ;;  %v1817_v60 = vsel %vm1272_vm7, %v1814_v1, %v1816_v2 }
 0x189   :  { %3239 = vmatprep.mubr.msk.bf16.mxu0 %vm3571_vm2, %v3570_v35 }
 0x18c   :  { %3152 = vmatmul.mubr.msk.bf16.vlgmr.msra.gmra.mrb[24].mxu1 %vm1035_vm4, %v3790_v32  ;;  %v1806_v32 = vrot.slane %v3867_v33, 1  ;;  %v1808_v33 = vrot.slane %v3881_v40, 1 }
 0x18d   :  { %3180 = vmatpush3.bf16.msra.mxu1 %v3518_v48  ;;  %3155 = vmatprep.mubr.msk.bf16.mxu1 %vm3571_vm2, %v3570_v35  ;;  %v2164_v48 = vrot.slane %v2162_v39, 1 }
 0x18e   :  { %3181 = vmatprep.subr.bf16.mxu1 %v3570_v35  ;;  %v1807_v58 = vsel %vm1272_vm7, %v1805_v56, %v1806_v32  ;;  %v1809_v61 = vsel %vm1272_vm7, %v1806_v32, %v1808_v33  ;;  %v1811_v40 = vsel %vm1272_vm7, %v1808_v33, %v1810_v62  ;;  %v2166_v56 = vshrl.u32 %v4085_v27, 16 }
 0x190   :  { %3240 = vmatmul.mubr.msk.bf16.gmra.mrb[56].mxu0 %vm1035_vm4, %v3906_v0 }
 0x191   :  { %3279 = vmatprep.mubr.msk.bf16.mxu0 %vm3571_vm2, %v3570_v35  ;;  %3182 = vmatpush3.bf16.msra.mxu1 %v3521_v52  ;;  %v2161_v52 = vor.u32 %v2159_v45, %v2157_v36 }
 0x192   :  { %3243 = vmatprep.subr.bf16.mxu1 %v3570_v35 }
 0x193   :  { %v2165_v32 = vsel %vm89_vm0, %v2161_v52, %v2164_v48 }
 0x194   :  { %3156 = vmatmul.mubr.msk.bf16.gmra.mrb[28].mxu1 %vm1035_vm4, %v3781_v25  ;;  %v2148_v25 = vshll.u32 %v3913_v7, 16 }
 0x195   :  { %3159 = vmatprep.mubr.msk.bf16.mxu1 %vm3571_vm2, %v3570_v35 }
 0x196   :  { %v2150_v14 = vrot.slane %v2148_v25, 1 }
 0x198   :  { %3280 = vmatmul.mubr.msk.bf16.vlgmr.msra.gmra.mrb[60].mxu0 %vm1035_vm4, %v1807_v58  ;;  %v2154_v23 = vor.u32 %v2152_v21, %v2150_v14  ;;  %v2168_v58 = vor.u32 %v2166_v56, %v2164_v48 }
 0x199   :  { %3283 = vmatprep.mubr.msk.bf16.mxu0 %vm3571_vm2, %v3570_v35  ;;  %3340 = vmatpush3.bf16.msra.mxu0 %v3524_v57  ;;  %v2169_v57 = vshll.u32 %v4100_v53, 16 }
 0x19a   :  { %3341 = vmatprep.subr.bf16.mxu0 %v3570_v35 }
 0x19b   :  { %v2171_v62 = vrot.slane %v2169_v57, 1 }
 0x19c   :  { %3160 = vmatmul.mubr.msk.bf16.gmra.mrb[32].mxu1 %vm1035_vm4, %v3804_v59  ;;  %v2151_v59 = vsel %vm89_vm0, %v2147_v18, %v2150_v14 }
 0x19d   :  { %3342 = vmatpush3.bf16.msra.mxu0 %v3526_v15  ;;  %3163 = vmatprep.mubr.msk.bf16.mxu1 %vm3571_vm2, %v3570_v35  ;;  %v4111_v15 = vld [vmem:[#allocation2 + $0x30] sm:$0xff]  }
 0x19e   :  { %3403 = vmatprep.subr.bf16.mxu0 %v3570_v35  ;;  %v2180_v4 = vshrl.u32 %v4111_v15, 16 }
 0x1a0   :  { %3284 = vmatmul.mubr.msk.bf16.gmra.mrb[64].mxu0 %vm1035_vm4, %v1809_v61  ;;  %v3533_v61 = vld [vmem:[#allocation2 + $0x30] ss:$0 sps:$4 sm:$0xff]  }
 0x1a1   :  { %3287 = vmatprep.mubr.msk.bf16.mxu0 %vm3571_vm2, %v3570_v35  ;;  %v1284_v63 = vrot.slane %v3533_v61, 1 }
 0x1a4   :  { %3164 = vmatmul.mubr.msk.bf16.gmra.mrb[36].mxu1 %vm1035_vm4, %v3824_v10  ;;  %v2158_v10 = vsel %vm89_vm0, %v2154_v23, %v2157_v36 }
 0x1a5   :  { %3167 = vmatprep.mubr.msk.bf16.mxu1 %vm3571_vm2, %v3570_v35 }
 0x1a8   :  { %3288 = vmatmul.mubr.msk.bf16.gmra.mrb[68].mxu0 %vm1035_vm4, %v1811_v40  ;;  %v2176_v40 = vshll.u32 %v4111_v15, 16 }
 0x1a9   :  { %3291 = vmatprep.mubr.msk.bf16.mxu0 %vm3571_vm2, %v3570_v35 }
 0x1aa   :  { %v2178_v1 = vrot.slane %v2176_v40, 1 }
 0x1ac   :  { %3168 = vmatmul.mubr.msk.bf16.gmra.mrb[40].mxu1 %vm1035_vm4, %v3854_v26  ;;  %v1282_v26 = vrot.slane %v3877_v37, 1  ;;  %v2182_v51 = vor.u32 %v2180_v4, %v2178_v1 }
 0x1ad   :  { %3171 = vmatprep.mubr.msk.bf16.mxu1 %vm3571_vm2, %v3570_v35 }
 0x1ae   :  { %v1283_v33 = vsel %vm1272_vm7, %v1280_v42, %v1282_v26 }
 0x1b0   :  { %3292 = vmatmul.mubr.msk.bf16.gmra.mrb[72].mxu0 %vm1035_vm4, %v1813_v46  ;;  %v2173_v46 = vshrl.u32 %v4100_v53, 16 }
 0x1b1   :  { %3295 = vmatprep.mubr.msk.bf16.mxu0 %vm3571_vm2, %v3570_v35 }
 0x1b2   :  { %v2175_v49 = vor.u32 %v2173_v46, %v2171_v62 }
 0x1b4   :  { %3172 = vmatmul.mubr.msk.bf16.gmra.mrb[44].mxu1 %vm1035_vm4, %v3877_v37  ;;  %v2172_v37 = vsel %vm89_vm0, %v2168_v58, %v2171_v62  ;;  %v2179_v3 = vsel %vm89_vm0, %v2175_v49, %v2178_v1 }
 0x1b5   :  { %3175 = vmatprep.mubr.msk.bf16.mxu1 %vm3571_vm2, %v3570_v35 }
 0x1b8   :  { %3296 = vmatmul.mubr.msk.bf16.gmra.mrb[76].mxu0 %vm1035_vm4, %v1815_v47  ;;  %v1285_v47 = vsel %vm1272_vm7, %v1282_v26, %v1284_v63 }
 0x1b9   :  { %3299 = vmatprep.mubr.msk.bf16.mxu0 %vm3571_vm2, %v3570_v35 }
 0x1bc   :  { %3176 = vmatmul.mubr.msk.bf16.gmra.mrb[48].mxu1 %vm1035_vm4, %v3889_v44  ;;  %v3525_v44 = vld [vmem:[%s4558_s3 + $0x40] sm:$0xff]  }
 0x1bd   :  { %3183 = vmatprep.mubr.msk.bf16.mxu1 %vm3571_vm2, %v3570_v35 }
 0x1c0   :  { %3300 = vmatmul.mubr.msk.bf16.gmra.mrb[80].mxu0 %vm1035_vm4, %v1817_v60 }
 0x1c1   :  { %3303 = vmatprep.mubr.msk.bf16.mxu0 %vm3571_vm2, %v3570_v35 }
 0x1c4   :  { %3184 = vmatmul.mubr.msk.bf16.vlgmr.msra.gmra.mrb[52].mxu1 %vm1035_vm4, %v1275_v9 }
 0x1c5   :  { %3244 = vmatpush3.bf16.msra.mxu1 %v3525_v44  ;;  %3187 = vmatprep.mubr.msk.bf16.mxu1 %vm3571_vm2, %v3570_v35  ;;  %v3536_v44 = vld [vmem:[%s4558_s3 + $0x60] sm:$0xff]  }
 0x1c6   :  { %3245 = vmatprep.subr.bf16.mxu1 %v3570_v35 }
 0x1c8   :  { %3304 = vmatmul.mubr.msk.bf16.gmra.mrb[84].mxu0 %vm1035_vm4, %v1816_v2  ;;  %v4125_v2 = vld [vmem:[#allocation2 + $0x38] ss:$0 sps:$4 sm:$0x77]  }
 0x1c9   :  { %3343 = vmatprep.mubr.msk.bf16.mxu0 %vm3571_vm2, %v3570_v35  ;;  %3246 = vmatpush3.bf16.msra.mxu1 %v3531_v43  ;;  %v2183_v60 = vshll.u32 %v4125_v2, 16  ;;  %v2187_v9 = vshrl.u32 %v4125_v2, 16  ;;  %v3537_v43 = vld [vmem:[%s4558_s3 + $0x68] sm:$0xff]  }
 0x1ca   :  { %3307 = vmatprep.subr.bf16.mxu1 %v3570_v35 }
 0x1cb   :  { %v2185_v5 = vrot.slane %v2183_v60, 1 }
 0x1cc   :  { %3188 = vmatmul.mubr.msk.bf16.gmra.mrb[56].mxu1 %vm1035_vm4, %v1277_v16 }
 0x1cd   :  { %3191 = vmatprep.mubr.msk.bf16.mxu1 %vm3571_vm2, %v3570_v35  ;;  %v2186_v29 = vsel %vm89_vm0, %v2182_v51, %v2185_v5  ;;  %v2189_v54 = vor.u32 %v2187_v9, %v2185_v5 }
 0x1d0   :  { %3344 = vmatmul.mubr.msk.bf16.vlgmr.msra.gmra.mrb[88].mxu0 %vm1035_vm4, %v2151_v59  ;;  %v3539_v59 = vld [vmem:[%s4558_s3 + $0x88] sm:$0xff]  }
 0x1d1   :  { %3347 = vmatprep.mubr.msk.bf16.mxu0 %vm3571_vm2, %v3570_v35 }
 0x1d4   :  { %3192 = vmatmul.mubr.msk.bf16.gmra.mrb[60].mxu1 %vm1035_vm4, %v1279_v31 }
 0x1d5   :  { %3195 = vmatprep.mubr.msk.bf16.mxu1 %vm3571_vm2, %v3570_v35 }
 0x1d8   :  { %3348 = vmatmul.mubr.msk.bf16.gmra.mrb[92].mxu0 %vm1035_vm4, %v2158_v10 }
 0x1d9   :  { %3351 = vmatprep.mubr.msk.bf16.mxu0 %vm3571_vm2, %v3570_v35 }
 0x1dc   :  { %3196 = vmatmul.mubr.msk.bf16.gmra.mrb[64].mxu1 %vm1035_vm4, %v1281_v50 }
 0x1dd   :  { %3199 = vmatprep.mubr.msk.bf16.mxu1 %vm3571_vm2, %v3570_v35 }
 0x1e0   :  { %3352 = vmatmul.mubr.msk.bf16.gmra.mrb[96].mxu0 %vm1035_vm4, %v2165_v32 }
 0x1e1   :  { %3355 = vmatprep.mubr.msk.bf16.mxu0 %vm3571_vm2, %v3570_v35 }
 0x1e4   :  { %3200 = vmatmul.mubr.msk.bf16.gmra.mrb[68].mxu1 %vm1035_vm4, %v1283_v33 }
 0x1e5   :  { %3203 = vmatprep.mubr.msk.bf16.mxu1 %vm3571_vm2, %v3570_v35 }
 0x1e8   :  { %3356 = vmatmul.mubr.msk.bf16.gmra.mrb[100].mxu0 %vm1035_vm4, %v2172_v37 }
 0x1e9   :  { %3359 = vmatprep.mubr.msk.bf16.mxu0 %vm3571_vm2, %v3570_v35 }
 0x1ec   :  { %3204 = vmatmul.mubr.msk.bf16.gmra.mrb[72].mxu1 %vm1035_vm4, %v1285_v47 }
 0x1ed   :  { %3207 = vmatprep.mubr.msk.bf16.mxu1 %vm3571_vm2, %v3570_v35 }
 0x1f0   :  { %3360 = vmatmul.mubr.msk.bf16.gmra.mrb[104].mxu0 %vm1035_vm4, %v2179_v3 }
 0x1f1   :  { %3363 = vmatprep.mubr.msk.bf16.mxu0 %vm3571_vm2, %v3570_v35 }
 0x1f4   :  { %3208 = vmatmul.mubr.msk.bf16.gmra.mrb[76].mxu1 %vm1035_vm4, %v1284_v63 }
 0x1f5   :  { %3247 = vmatprep.mubr.msk.bf16.mxu1 %vm3571_vm2, %v3570_v35 }
 0x1f8   :  { %3364 = vmatmul.mubr.msk.bf16.gmra.mrb[108].mxu0 %vm1035_vm4, %v2186_v29 }
 0x1f9   :  { %3367 = vmatprep.mubr.msk.bf16.mxu0 %vm3571_vm2, %v3570_v35 }
 0x1fc   :  { %3248 = vmatmul.mubr.msk.bf16.vlgmr.msra.gmra.mrb[80].mxu1 %vm1035_vm4, %v3916_v8  ;;  %v1655_v8 = vshrl.u32 %v3906_v0, 16  ;;  %v3538_v0 = vld [vmem:[%s4558_s3 + $0x80] sm:$0xff]  }
 0x1fd   :  { %3308 = vmatpush3.bf16.msra.mxu1 %v3536_v44  ;;  %3251 = vmatprep.mubr.msk.bf16.mxu1 %vm3571_vm2, %v3570_v35 }
 0x1fe   :  { %3309 = vmatprep.subr.bf16.mxu1 %v3570_v35 }
 0x200   :  { %3368 = vmatmul.mubr.msk.bf16.gmra.mrb[112].mxu0 %vm1035_vm4, %v2189_v54 }
 0x201   :  { %3417 = vmatprep.mubr.msk.bf16.mxu0 %vm3571_vm2, %v3570_v35  ;;  %3310 = vmatpush3.bf16.msra.mxu1 %v3537_v43 }
 0x202   :  { %3371 = vmatprep.subr.bf16.mxu1 %v3570_v35 }
 0x204   :  { %3252 = vmatmul.mubr.msk.bf16.gmra.mrb[84].mxu1 %vm1035_vm4, %v3924_v17 }
 0x205   :  { %3255 = vmatprep.mubr.msk.bf16.mxu1 %vm3571_vm2, %v3570_v35 }
 0x20c   :  { %3256 = vmatmul.mubr.msk.bf16.gmra.mrb[88].mxu1 %vm1035_vm4, %v3929_v55  ;;  %v1657_v55 = vor.u32 %v1655_v8, %v3934_v24 }
 0x20d   :  { %3259 = vmatprep.mubr.msk.bf16.mxu1 %vm3571_vm2, %v3570_v35 }
 0x214   :  { %3260 = vmatmul.mubr.msk.bf16.gmra.mrb[92].mxu1 %vm1035_vm4, %v3940_v30 }
 0x215   :  { %3263 = vmatprep.mubr.msk.bf16.mxu1 %vm3571_vm2, %v3570_v35 }
 0x21c   :  { %3264 = vmatmul.mubr.msk.bf16.gmra.mrb[96].mxu1 %vm1035_vm4, %v3943_v34 }
 0x21d   :  { %3267 = vmatprep.mubr.msk.bf16.mxu1 %vm3571_vm2, %v3570_v35 }
 0x224   :  { %3268 = vmatmul.mubr.msk.bf16.gmra.mrb[100].mxu1 %vm1035_vm4, %v3953_v41 }
 0x225   :  { %3271 = vmatprep.mubr.msk.bf16.mxu1 %vm3571_vm2, %v3570_v35 }
 0x22b   :  { %v4179_v17 = vpop.f32.mrb[28].mxu0 }
 0x22c   :  { %v3121_v30 = vpop.f32.mrb[29].mxu0  ;;  %3272 = vmatmul.mubr.msk.bf16.gmra.mrb[104].mxu1 %vm1035_vm4, %v1657_v55 }
 0x22d   :  { %v4182_v25 = vpop.f32.mrb[30].mxu0  ;;  %3311 = vmatprep.mubr.msk.bf16.mxu1 %vm3571_vm2, %v3570_v35 }
 0x22e   :  { %v3122_v34 = vpop.f32.mrb[31].mxu0 }
 0x22f   :  { %v4187_v11 = vpop.f32.mrb[0].mxu1 }
 0x230   :  { %v3125_v41 = vpop.f32.mrb[1].mxu1 }
 0x231   :  { %v4189_v12 = vpop.f32.mrb[2].mxu1 }
 0x232   :  { %v3126_v24 = vpop.f32.mrb[3].mxu1 }
 0x233   :  { %v4194_v13 = vpop.f32.mrb[32].mxu0 }
 0x234   :  { %v3217_v14 = vpop.f32.mrb[33].mxu0  ;;  %3312 = vmatmul.mubr.msk.bf16.vlgmr.msra.gmra.mrb[108].mxu1 %vm1035_vm4, %v4050_v6 }
 0x235   :  { %v4196_v16 = vpop.f32.mrb[34].mxu0  ;;  %3372 = vmatpush3.bf16.msra.mxu1 %v3538_v0  ;;  %3315 = vmatprep.mubr.msk.bf16.mxu1 %vm3571_vm2, %v3570_v35 }
 0x236   :  { %v3218_v18 = vpop.f32.mrb[35].mxu0  ;;  %3373 = vmatprep.subr.bf16.mxu1 %v3570_v35 }
 0x237   :  { %v4206_v20 = vpop.f32.mrb[4].mxu1 }
 0x238   :  { %v3129_v21 = vpop.f32.mrb[5].mxu1 }
 0x239   :  { %v4208_v22 = vpop.f32.mrb[6].mxu1  ;;  %3374 = vmatpush3.bf16.msra.mxu1 %v3539_v59 }
 0x23a   :  { %v3130_v6 = vpop.f32.mrb[7].mxu1 }
 0x23b   :  { %v4210_v23 = vpop.f32.mrb[36].mxu0 }
 0x23c   :  { %v3221_v31 = vpop.f32.mrb[37].mxu0  ;;  %3316 = vmatmul.mubr.msk.bf16.gmra.mrb[112].mxu1 %vm1035_vm4, %v3913_v7 }
 0x23d   :  { %v4212_v36 = vpop.f32.mrb[38].mxu0  ;;  %3319 = vmatprep.mubr.msk.bf16.mxu1 %vm3571_vm2, %v3570_v35 }
 0x23e   :  { %v3222_v10 = vpop.f32.mrb[39].mxu0 }
 0x23f   :  { %v4218_v39 = vpop.f32.mrb[8].mxu1 }
 0x240   :  { %v3133_v42 = vpop.f32.mrb[9].mxu1 }
 0x241   :  { %v4220_v45 = vpop.f32.mrb[10].mxu1 }
 0x242   :  { %v3134_v50 = vpop.f32.mrb[11].mxu1 }
 0x243   :  { %v4222_v48 = vpop.f32.mrb[40].mxu0 }
 0x244   :  { %v3225_v52 = vpop.f32.mrb[41].mxu0  ;;  %3320 = vmatmul.mubr.msk.bf16.gmra.mrb[116].mxu1 %vm1035_vm4, %v4074_v19 }
 0x245   :  { %v4224_v32 = vpop.f32.mrb[42].mxu0  ;;  %3323 = vmatprep.mubr.msk.bf16.mxu1 %vm3571_vm2, %v3570_v35 }
 0x246   :  { %v3226_v26 = vpop.f32.mrb[43].mxu0 }
 0x247   :  { %v4230_v56 = vpop.f32.mrb[12].mxu1 }
 0x248   :  { %v3137_v57 = vpop.f32.mrb[13].mxu1 }
 0x249   :  { %v4232_v58 = vpop.f32.mrb[14].mxu1  ;;  %v2340_v57 = vrot.slane %v4074_v19, 1 }
 0x24a   :  { %v3138_v61 = vpop.f32.mrb[15].mxu1 }
 0x24b   :  { %v4234_v33 = vpop.f32.mrb[44].mxu0 }
 0x24c   :  { %v3229_v62 = vpop.f32.mrb[45].mxu0  ;;  %3324 = vmatmul.mubr.msk.bf16.gmra.mrb[120].mxu1 %vm1035_vm4, %v4085_v27 }
 0x24d   :  { %v4236_v37 = vpop.f32.mrb[46].mxu0  ;;  %3327 = vmatprep.mubr.msk.bf16.mxu1 %vm3571_vm2, %v3570_v35 }
 0x24e   :  { %v3230_v40 = vpop.f32.mrb[47].mxu0 }
 0x24f   :  { %v4242_v63 = vpop.f32.mrb[16].mxu1 }
 0x250   :  { %v3141_v46 = vpop.f32.mrb[17].mxu1 }
 0x251   :  { %v4244_v1 = vpop.f32.mrb[18].mxu1 }
 0x252   :  { %v3142_v49 = vpop.f32.mrb[19].mxu1 }
 0x253   :  { %v4246_v47 = vpop.f32.mrb[48].mxu0 }
 0x254   :  { %v3233_v3 = vpop.f32.mrb[49].mxu0  ;;  %3328 = vmatmul.mubr.msk.bf16.gmra.mrb[124].mxu1 %vm1035_vm4, %v4100_v53 }
 0x255   :  { %v4248_v4 = vpop.f32.mrb[50].mxu0  ;;  %3331 = vmatprep.mubr.msk.bf16.mxu1 %vm3571_vm2, %v3570_v35 }
 0x256   :  { %v3234_v60 = vpop.f32.mrb[51].mxu0 }
 0x257   :  { %v4254_v51 = vpop.f32.mrb[20].mxu1 }
 0x258   :  { %v3145_v5 = vpop.f32.mrb[21].mxu1 }
 0x259   :  { %v1142_v29 = vpop.f32.mrb[22].mxu1 }
 0x25a   :  { %v3146_v9 = vpop.f32.mrb[23].mxu1 }
 0x25b   :  { %v4256_v44 = vpop.f32.mrb[52].mxu0 }
 0x25c   :  { %v3237_v54 = vpop.f32.mrb[53].mxu0  ;;  %3332 = vmatmul.mubr.msk.bf16.gmra.mrb[128].mxu1 %vm1035_vm4, %v4111_v15 }
 0x25d   :  { %v4258_v43 = vpop.f32.mrb[54].mxu0  ;;  %3335 = vmatprep.mubr.msk.bf16.mxu1 %vm3571_vm2, %v3570_v35 }
 0x25e   :  { %v3238_v8 = vpop.f32.mrb[55].mxu0 }
 0x25f   :  { %v1205_v55 = vpop.f32.mrb[24].mxu1 }
 0x260   :  { %v4265_v30 = vadd.f32 %v1205_v55, %v4179_v17  ;;  %v3153_v34 = vpop.f32.mrb[25].mxu1 }
 0x261   :  { %v1208_v41 = vpop.f32.mrb[26].mxu1 }
 0x262   :  { %v4268_v0 = vadd.f32 %v1208_v41, %v4182_v25  ;;  %v3154_v14 = vpop.f32.mrb[27].mxu1 }
 0x263   :  { %v4270_v24 = vpop.f32.mrb[56].mxu0 }
 0x264   :  { %v3241_v18 = vpop.f32.mrb[57].mxu0  ;;  %3336 = vmatmul.mubr.msk.bf16.gmra.mrb[132].mxu1 %vm1035_vm4, %v4125_v2 }
 0x265   :  { %v1589_v59 = vpop.f32.mrb[58].mxu0  ;;  %3375 = vmatprep.mubr.msk.bf16.mxu1 %vm3571_vm2, %v3570_v35 }
 0x266   :  { %v3242_v21 = vpop.f32.mrb[59].mxu0 }
 0x267   :  { %v1213_v6 = vpop.f32.mrb[28].mxu1 }
 0x268   :  { %v4277_v17 = vadd.f32 %v1213_v6, %v4187_v11  ;;  %v3157_v31 = vpop.f32.mrb[29].mxu1 }
 0x269   :  { %v1216_v10 = vpop.f32.mrb[30].mxu1 }
 0x26a   :  { %v4280_v25 = vadd.f32 %v1216_v10, %v4189_v12  ;;  %v3158_v50 = vpop.f32.mrb[31].mxu1 }
 0x26b   :  { %v4282_v42 = vpop.f32.mrb[60].mxu0 }
 0x26c   :  { %v3281_v52 = vpop.f32.mrb[61].mxu0  ;;  %3376 = vmatmul.mubr.msk.bf16.vlgmr.msra.gmra.mrb[136].mxu1 %vm1035_vm4, %v3948_v38  ;;  %v2341_v38 = vsel %vm1272_vm7, %v2338_v28, %v2340_v57 }
 0x26d   :  { %v4284_v26 = vpop.f32.mrb[62].mxu0  ;;  %3379 = vmatprep.mubr.msk.bf16.mxu1 %vm3571_vm2, %v3570_v35 }
 0x26e   :  { %v3282_v2 = vpop.f32.mrb[63].mxu0 }
 0x26f   :  { %v1221_v11 = vpop.f32.mrb[32].mxu1 }
 0x270   :  { %v4292_v61 = vadd.f32 %v1221_v11, %v4206_v20  ;;  %v3161_v12 = vpop.f32.mrb[33].mxu1 }
 0x271   :  { %v1224_v62 = vpop.f32.mrb[34].mxu1 }
 0x272   :  { %v4295_v40 = vadd.f32 %v1224_v62, %v4208_v22  ;;  %v3162_v49 = vpop.f32.mrb[35].mxu1  ;;  %v2342_v22 = vrot.slane %v4085_v27, 1 }
 0x273   :  { %v4297_v46 = vpop.f32.mrb[64].mxu0 }
 0x274   :  { %v3285_v3 = vpop.f32.mrb[65].mxu0  ;;  %3380 = vmatmul.mubr.msk.bf16.gmra.mrb[140].mxu1 %vm1035_vm4, %v2341_v38  ;;  %v2343_v55 = vsel %vm1272_vm7, %v2340_v57, %v2342_v22 }
 0x275   :  { %v4302_v60 = vpop.f32.mrb[66].mxu0  ;;  %3383 = vmatprep.mubr.msk.bf16.mxu1 %vm3571_vm2, %v3570_v35 }
 0x276   :  { %v3286_v19 = vpop.f32.mrb[67].mxu0 }
 0x277   :  { %v1229_v20 = vpop.f32.mrb[36].mxu1 }
 0x278   :  { %v4309_v5 = vadd.f32 %v1229_v20, %v4218_v39  ;;  %v3165_v29 = vpop.f32.mrb[37].mxu1  ;;  %v2344_v39 = vrot.slane %v4100_v53, 1 }
 0x279   :  { %v1232_v9 = vpop.f32.mrb[38].mxu1 }
 0x27a   :  { %v4312_v7 = vadd.f32 %v1232_v9, %v4220_v45  ;;  %v3166_v54 = vpop.f32.mrb[39].mxu1  ;;  %v2345_v10 = vsel %vm1272_vm7, %v2342_v22, %v2344_v39 }
 0x27b   :  { %v4314_v28 = vpop.f32.mrb[68].mxu0 }
 0x27c   :  { %v3289_v8 = vpop.f32.mrb[69].mxu0  ;;  %3384 = vmatmul.mubr.msk.bf16.gmra.mrb[144].mxu1 %vm1035_vm4, %v2343_v55 }
 0x27d   :  { %v4317_v34 = vpop.f32.mrb[70].mxu0  ;;  %3387 = vmatprep.mubr.msk.bf16.mxu1 %vm3571_vm2, %v3570_v35 }
 0x27e   :  { %v3290_v41 = vpop.f32.mrb[71].mxu0 }
 0x27f   :  { %v1237_v27 = vpop.f32.mrb[40].mxu1 }
 0x280   :  { %v4324_v45 = vadd.f32 %v1237_v27, %v4230_v56  ;;  %v3169_v14 = vpop.f32.mrb[41].mxu1  ;;  %v2346_v56 = vrot.slane %v4111_v15, 1  ;;  %v3541_v15 = vld [vmem:[#allocation2 + $0x38] ss:$0 sps:$4 sm:$0xff]  }
 0x281   :  { %v1240_v18 = vpop.f32.mrb[42].mxu1  ;;  %v2348_v29 = vrot.slane %v3541_v15, 1 }
 0x282   :  { %v4327_v59 = vadd.f32 %v1240_v18, %v4232_v58  ;;  %v3170_v6 = vpop.f32.mrb[43].mxu1  ;;  %v2347_v3 = vsel %vm1272_vm7, %v2344_v39, %v2346_v56 }
 0x283   :  { %v4329_v21 = vpop.f32.mrb[72].mxu0  ;;  %v2349_v55 = vsel %vm1272_vm7, %v2346_v56, %v2348_v29 }
 0x284   :  { %v3293_v31 = vpop.f32.mrb[73].mxu0  ;;  %3388 = vmatmul.mubr.msk.bf16.gmra.mrb[148].mxu1 %vm1035_vm4, %v2345_v10 }
 0x285   :  { %v4332_v50 = vpop.f32.mrb[74].mxu0  ;;  %3391 = vmatprep.mubr.msk.bf16.mxu1 %vm3571_vm2, %v3570_v35 }
 0x286   :  { %v3294_v52 = vpop.f32.mrb[75].mxu0 }
 0x287   :  { %v1245_v53 = vpop.f32.mrb[44].mxu1 }
 0x288   :  { %v4339_v58 = vadd.f32 %v1245_v53, %v4242_v63  ;;  %v3173_v2 = vpop.f32.mrb[45].mxu1 }
 0x289   :  { %v1248_v11 = vpop.f32.mrb[46].mxu1 }
 0x28a   :  { %v4342_v57 = vadd.f32 %v1248_v11, %v4244_v1  ;;  %v3174_v62 = vpop.f32.mrb[47].mxu1 }
 0x28b   :  { %v4344_v12 = vpop.f32.mrb[76].mxu0 }
 0x28c   :  { %v3297_v49 = vpop.f32.mrb[77].mxu0  ;;  %3392 = vmatmul.mubr.msk.bf16.gmra.mrb[152].mxu1 %vm1035_vm4, %v2347_v3 }
 0x28d   :  { %v4347_v38 = vpop.f32.mrb[78].mxu0  ;;  %3395 = vmatprep.mubr.msk.bf16.mxu1 %vm3571_vm2, %v3570_v35 }
 0x28e   :  { %v3298_v19 = vpop.f32.mrb[79].mxu0 }
 0x28f   :  { %v1253_v63 = vpop.f32.mrb[48].mxu1 }
 0x290   :  { %v4353_v20 = vadd.f32 %v1253_v63, %v4254_v51  ;;  %v3177_v1 = vpop.f32.mrb[49].mxu1 }
 0x291   :  { %v1256_v22 = vpop.f32.mrb[50].mxu1 }
 0x292   :  { %v3178_v54 = vpop.f32.mrb[51].mxu1 }
 0x293   :  { %v4355_v9 = vpop.f32.mrb[80].mxu0 }
 0x294   :  { %v3301_v8 = vpop.f32.mrb[81].mxu0  ;;  %3396 = vmatmul.mubr.msk.bf16.gmra.mrb[156].mxu1 %vm1035_vm4, %v2349_v55 }
 0x295   :  { %v4358_v41 = vpop.f32.mrb[82].mxu0  ;;  %3399 = vmatprep.mubr.msk.bf16.mxu1 %vm3571_vm2, %v3570_v35 }
 0x296   :  { %v3302_v27 = vpop.f32.mrb[83].mxu0 }
 0x297   :  { %v1353_v39 = vpop.f32.mrb[52].mxu1 }
 0x298   :  { %v1407_v51 = vadd.f32 %v1353_v39, %v4265_v30  ;;  %v3185_v14 = vpop.f32.mrb[53].mxu1 }
 0x299   :  { %v1356_v18 = vpop.f32.mrb[54].mxu1 }
 0x29a   :  { %v1408_v6 = vadd.f32 %v1356_v18, %v4268_v0  ;;  %v3186_v10 = vpop.f32.mrb[55].mxu1  ;;  %v4368_v52 = vadd.f32 %v4194_v13, %v1407_v51 }
 0x29b   :  { %v4365_v31 = vpop.f32.mrb[84].mxu0 }
 0x29c   :  { %v3305_v53 = vpop.f32.mrb[85].mxu0  ;;  %3400 = vmatmul.mubr.msk.bf16.gmra.mrb[160].mxu1 %vm1035_vm4, %v2348_v29  ;;  %v4372_v2 = vadd.f32 %v4196_v16, %v1408_v6 }
 0x29d   :  { %v1936_v56 = vpop.f32.mrb[86].mxu0 }
 0x29e   :  { %v3306_v11 = vpop.f32.mrb[87].mxu0 }
 0x29f   :  { %v1361_v62 = vpop.f32.mrb[56].mxu1 }
 0x2a0   :  { %v1409_v30 = vadd.f32 %v1361_v62, %v4277_v17  ;;  %v3189_v49 = vpop.f32.mrb[57].mxu1 }
 0x2a1   :  { %v1364_v3 = vpop.f32.mrb[58].mxu1 }
 0x2a2   :  { %v1410_v0 = vadd.f32 %v1364_v3, %v4280_v25  ;;  %v3190_v15 = vpop.f32.mrb[59].mxu1  ;;  %v4379_v13 = vadd.f32 %v4210_v23, %v1409_v30 }
 0x2a3   :  { %v4376_v19 = vpop.f32.mrb[88].mxu0 }
 0x2a4   :  { %v3345_v63 = vpop.f32.mrb[89].mxu0  ;;  %v4384_v16 = vadd.f32 %v4212_v36, %v1410_v0 }
 0x2a5   :  { %v4381_v1 = vpop.f32.mrb[90].mxu0 }
 0x2a6   :  { %v3346_v22 = vpop.f32.mrb[91].mxu0 }
 0x2a7   :  { %v1369_v29 = vpop.f32.mrb[60].mxu1 }
 0x2a8   :  { %v1411_v17 = vadd.f32 %v1369_v29, %v4292_v61  ;;  %v3193_v54 = vpop.f32.mrb[61].mxu1 }
 0x2a9   :  { %v1372_v8 = vpop.f32.mrb[62].mxu1 }
 0x2aa   :  { %v1412_v25 = vadd.f32 %v1372_v8, %v4295_v40  ;;  %v3194_v27 = vpop.f32.mrb[63].mxu1  ;;  %v4391_v23 = vadd.f32 %v4222_v48, %v1411_v17 }
 0x2ab   :  { %v4388_v55 = vpop.f32.mrb[92].mxu0 }
 0x2ac   :  { %v3349_v39 = vpop.f32.mrb[93].mxu0  ;;  %v4396_v36 = vadd.f32 %v4224_v32, %v1412_v25 }
 0x2ad   :  { %v4393_v51 = vpop.f32.mrb[94].mxu0 }
 0x2ae   :  { %v3350_v14 = vpop.f32.mrb[95].mxu0 }
 0x2af   :  { %v1377_v18 = vpop.f32.mrb[64].mxu1 }
 0x2b0   :  { %v1413_v61 = vadd.f32 %v1377_v18, %v4309_v5  ;;  %v3197_v6 = vpop.f32.mrb[65].mxu1 }
 0x2b1   :  { %v1380_v10 = vpop.f32.mrb[66].mxu1 }
 0x2b2   :  { %v1414_v40 = vadd.f32 %v1380_v10, %v4312_v7  ;;  %v3198_v56 = vpop.f32.mrb[67].mxu1  ;;  %v4403_v48 = vadd.f32 %v4234_v33, %v1413_v61 }
 0x2b3   :  { %v4400_v53 = vpop.f32.mrb[96].mxu0 }
 0x2b4   :  { %v3353_v11 = vpop.f32.mrb[97].mxu0  ;;  %v4408_v32 = vadd.f32 %v4236_v37, %v1414_v40 }
 0x2b5   :  { %v4405_v62 = vpop.f32.mrb[98].mxu0 }
 0x2b6   :  { %v3354_v30 = vpop.f32.mrb[99].mxu0 }
 0x2b7   :  { %v1385_v49 = vpop.f32.mrb[68].mxu1 }
 0x2b8   :  { %v1415_v5 = vadd.f32 %v1385_v49, %v4324_v45  ;;  %v3201_v3 = vpop.f32.mrb[69].mxu1 }
 0x2b9   :  { %v1388_v0 = vpop.f32.mrb[70].mxu1 }
 0x2ba   :  { %v1416_v7 = vadd.f32 %v1388_v0, %v4327_v59  ;;  %v3202_v63 = vpop.f32.mrb[71].mxu1  ;;  %v4415_v33 = vadd.f32 %v4246_v47, %v1415_v5 }
 0x2bb   :  { %v4412_v15 = vpop.f32.mrb[100].mxu0 }
 0x2bc   :  { %v3357_v22 = vpop.f32.mrb[101].mxu0  ;;  %v4420_v37 = vadd.f32 %v4248_v4, %v1416_v7 }
 0x2bd   :  { %v4417_v29 = vpop.f32.mrb[102].mxu0 }
 0x2be   :  { %v3358_v17 = vpop.f32.mrb[103].mxu0 }
 0x2bf   :  { %v1393_v54 = vpop.f32.mrb[72].mxu1 }
 0x2c0   :  { %v1417_v45 = vadd.f32 %v1393_v54, %v4339_v58  ;;  %v3205_v8 = vpop.f32.mrb[73].mxu1 }
 0x2c1   :  { %v1396_v25 = vpop.f32.mrb[74].mxu1 }
 0x2c2   :  { %v1418_v59 = vadd.f32 %v1396_v25, %v4342_v57  ;;  %v3206_v39 = vpop.f32.mrb[75].mxu1  ;;  %v1602_v47 = vadd.f32 %v4256_v44, %v1417_v45 }
 0x2c3   :  { %v4424_v27 = vpop.f32.mrb[104].mxu0 }
 0x2c4   :  { %v3361_v14 = vpop.f32.mrb[105].mxu0  ;;  %v1603_v61 = vadd.f32 %v4258_v43, %v1418_v59 }
 0x2c5   :  { %v4427_v18 = vpop.f32.mrb[106].mxu0 }
 0x2c6   :  { %v3362_v4 = vpop.f32.mrb[107].mxu0 }
 0x2c7   :  { %v1401_v6 = vpop.f32.mrb[76].mxu1 }
 0x2c8   :  { %v1419_v10 = vadd.f32 %v1401_v6, %v4353_v20  ;;  %v3209_v40 = vpop.f32.mrb[77].mxu1 }
 0x2c9   :  { %v1404_v58 = vpop.f32.mrb[78].mxu1 }
 0x2ca   :  { %v3210_v11 = vpop.f32.mrb[79].mxu1  ;;  %v1604_v57 = vadd.f32 %v4270_v24, %v1419_v10 }
 0x2cb   :  { %v4431_v56 = vpop.f32.mrb[108].mxu0 }
 0x2cc   :  { %v3365_v30 = vpop.f32.mrb[109].mxu0 }
 0x2cd   :  { %v4434_v49 = vpop.f32.mrb[110].mxu0 }
 0x2ce   :  { %v3366_v44 = vpop.f32.mrb[111].mxu0 }
 0x2cf   :  { %v1725_v5 = vpop.f32.mrb[80].mxu1 }
 0x2d0   :  { %v1779_v3 = vadd.f32 %v1725_v5, %v4368_v52  ;;  %v3249_v0 = vpop.f32.mrb[81].mxu1 }
 0x2d1   :  { %v1728_v43 = vpop.f32.mrb[82].mxu1 }
 0x2d2   :  { %v1780_v7 = vadd.f32 %v1728_v43, %v4372_v2  ;;  %v3250_v20 = vpop.f32.mrb[83].mxu1  ;;  %v1939_v22 = vadd.f32 %v4282_v42, %v1779_v3 }
 0x2d3   :  { %v4438_v63 = vpop.f32.mrb[112].mxu0 }
 0x2d4   :  { %v3369_v17 = vpop.f32.mrb[113].mxu0  ;;  %v1940_v24 = vadd.f32 %v4284_v26, %v1780_v7 }
 0x2d5   :  { %v2308_v54 = vpop.f32.mrb[114].mxu0 }
 0x2d6   :  { %v3370_v45 = vpop.f32.mrb[115].mxu0 }
 0x2d7   :  { %v1733_v8 = vpop.f32.mrb[84].mxu1 }
 0x2d8   :  { %v1781_v25 = vadd.f32 %v1733_v8, %v4379_v13  ;;  %v3253_v59 = vpop.f32.mrb[85].mxu1 }
 0x2d9   :  { %v1736_v39 = vpop.f32.mrb[86].mxu1 }
 0x2da   :  { %v1782_v52 = vadd.f32 %v1736_v39, %v4384_v16  ;;  %v3254_v14 = vpop.f32.mrb[87].mxu1  ;;  %v1941_v2 = vadd.f32 %v4297_v46, %v1781_v25 }
 0x2dc   :  { %v1942_v4 = vadd.f32 %v4302_v60, %v1782_v52 }
 0x2df   :  { %v1741_v6 = vpop.f32.mrb[88].mxu1 }
 0x2e0   :  { %v1783_v42 = vadd.f32 %v1741_v6, %v4391_v23  ;;  %v3257_v10 = vpop.f32.mrb[89].mxu1 }
 0x2e1   :  { %v1744_v40 = vpop.f32.mrb[90].mxu1 }
 0x2e2   :  { %v1784_v26 = vadd.f32 %v1744_v40, %v4396_v36  ;;  %v3258_v58 = vpop.f32.mrb[91].mxu1  ;;  %v1943_v11 = vadd.f32 %v4314_v28, %v1783_v42 }
 0x2e4   :  { %v1944_v13 = vadd.f32 %v4317_v34, %v1784_v26 }
 0x2e7   :  { %v1749_v30 = vpop.f32.mrb[92].mxu1 }
 0x2e8   :  { %v1785_v16 = vadd.f32 %v1749_v30, %v4403_v48  ;;  %v3261_v44 = vpop.f32.mrb[93].mxu1 }
 0x2e9   :  { %v1752_v5 = vpop.f32.mrb[94].mxu1 }
 0x2ea   :  { %v1786_v46 = vadd.f32 %v1752_v5, %v4408_v32  ;;  %v3262_v60 = vpop.f32.mrb[95].mxu1  ;;  %v1945_v3 = vadd.f32 %v4329_v21, %v1785_v16 }
 0x2ec   :  { %v1946_v23 = vadd.f32 %v4332_v50, %v1786_v46 }
 0x2ef   :  { %v1757_v0 = vpop.f32.mrb[96].mxu1 }
 0x2f0   :  { %v1787_v36 = vadd.f32 %v1757_v0, %v4415_v33  ;;  %v3265_v43 = vpop.f32.mrb[97].mxu1 }
 0x2f1   :  { %v1760_v7 = vpop.f32.mrb[98].mxu1 }
 0x2f2   :  { %v1788_v28 = vadd.f32 %v1760_v7, %v4420_v37  ;;  %v3266_v34 = vpop.f32.mrb[99].mxu1  ;;  %v1947_v20 = vadd.f32 %v4344_v12, %v1787_v36 }
 0x2f4   :  { %v1948_v48 = vadd.f32 %v4347_v38, %v1788_v28 }
 0x2f7   :  { %v1765_v17 = vpop.f32.mrb[100].mxu1 }
 0x2f8   :  { %v1789_v54 = vadd.f32 %v1765_v17, %v1602_v47  ;;  %v3269_v32 = vpop.f32.mrb[101].mxu1 }
 0x2f9   :  { %v1768_v45 = vpop.f32.mrb[102].mxu1 }
 0x2fa   :  { %v1790_v8 = vadd.f32 %v1768_v45, %v1603_v61  ;;  %v3270_v21 = vpop.f32.mrb[103].mxu1  ;;  %v1949_v50 = vadd.f32 %v4355_v9, %v1789_v54 }
 0x2fc   :  { %v1950_v25 = vadd.f32 %v4358_v41, %v1790_v8 }
 0x2ff   :  { %v1773_v33 = vpop.f32.mrb[104].mxu1 }
 0x300   :  { %v1791_v59 = vadd.f32 %v1773_v33, %v1604_v57  ;;  %v3273_v39 = vpop.f32.mrb[105].mxu1 }
 0x301   :  { %v1776_v52 = vpop.f32.mrb[106].mxu1 }
 0x302   :  { %v3274_v37 = vpop.f32.mrb[107].mxu1  ;;  %v1951_v14 = vadd.f32 %v4365_v31, %v1791_v59 }
 0x307   :  { %v2070_v12 = vpop.f32.mrb[108].mxu1 }
 0x308   :  { %v2124_v6 = vadd.f32 %v2070_v12, %v1939_v22  ;;  %v3313_v38 = vpop.f32.mrb[109].mxu1 }
 0x309   :  { %v2073_v42 = vpop.f32.mrb[110].mxu1 }
 0x30a   :  { %v2125_v47 = vadd.f32 %v2073_v42, %v1940_v24  ;;  %v3314_v10 = vpop.f32.mrb[111].mxu1  ;;  %v2311_v61 = vadd.f32 %v4376_v19, %v2124_v6 }
 0x30c   :  { %v2312_v40 = vadd.f32 %v4381_v1, %v2125_v47 }
 0x30f   :  { %v2078_v9 = vpop.f32.mrb[112].mxu1 }
 0x310   :  { %v2126_v26 = vadd.f32 %v2078_v9, %v1941_v2  ;;  %v3317_v41 = vpop.f32.mrb[113].mxu1 }
 0x311   :  { %v2081_v58 = vpop.f32.mrb[114].mxu1 }
 0x312   :  { %v2127_v57 = vadd.f32 %v2081_v58, %v1942_v4  ;;  %v3318_v30 = vpop.f32.mrb[115].mxu1  ;;  %v2313_v16 = vadd.f32 %v4388_v55, %v2126_v26 }
 0x314   :  { %v2314_v31 = vadd.f32 %v4393_v51, %v2127_v57 }
 0x317   :  { %v2086_v44 = vpop.f32.mrb[116].mxu1 }
 0x318   :  { %v2128_v22 = vadd.f32 %v2086_v44, %v1943_v11  ;;  %v3321_v5 = vpop.f32.mrb[117].mxu1 }
 0x319   :  { %v2089_v46 = vpop.f32.mrb[118].mxu1 }
 0x31a   :  { %v2129_v24 = vadd.f32 %v2089_v46, %v1944_v13  ;;  %v3322_v60 = vpop.f32.mrb[119].mxu1  ;;  %v2315_v19 = vadd.f32 %v4400_v53, %v2128_v22 }
 0x31c   :  { %v2316_v1 = vadd.f32 %v4405_v62, %v2129_v24 }
 0x31f   :  { %v2094_v0 = vpop.f32.mrb[120].mxu1 }
 0x320   :  { %v2130_v2 = vadd.f32 %v2094_v0, %v1945_v3  ;;  %v3325_v36 = vpop.f32.mrb[121].mxu1 }
 0x321   :  { %v2097_v43 = vpop.f32.mrb[122].mxu1 }
 0x322   :  { %v2131_v4 = vadd.f32 %v2097_v43, %v1946_v23  ;;  %v3326_v7 = vpop.f32.mrb[123].mxu1  ;;  %v4468_v55 = vadd.f32 %v4412_v15, %v2130_v2 }
 0x324   :  { %v4471_v51 = vadd.f32 %v4417_v29, %v2131_v4 }
 0x327   :  { %v2102_v11 = vpop.f32.mrb[124].mxu1 }
 0x328   :  { %v2132_v28 = vadd.f32 %v2102_v11, %v1947_v20  ;;  %v3329_v13 = vpop.f32.mrb[125].mxu1 }
 0x329   :  { %v2105_v34 = vpop.f32.mrb[126].mxu1 }
 0x32a   :  { %v2133_v17 = vadd.f32 %v2105_v34, %v1948_v48  ;;  %v3330_v53 = vpop.f32.mrb[127].mxu1  ;;  %v4474_v62 = vadd.f32 %v4424_v27, %v2132_v28 }
 0x32c   :  { %v4477_v3 = vadd.f32 %v4427_v18, %v2133_v17 }
 0x32f   :  { %v2110_v23 = vpop.f32.mrb[128].mxu1 }
 0x330   :  { %v2134_v54 = vadd.f32 %v2110_v23, %v1949_v50  ;;  %v3333_v32 = vpop.f32.mrb[129].mxu1  ;;  %v4491_v50 = vld [vmem:[%s4559_s4] ss:$0 sm:$0xff] }
 0x331   :  { %v2113_v15 = vpop.f32.mrb[130].mxu1 }
 0x332   :  { %v2135_v45 = vadd.f32 %v2113_v15, %v1950_v25  ;;  %v3334_v8 = vpop.f32.mrb[131].mxu1  ;;  %v4480_v29 = vadd.f32 %v4431_v56, %v2134_v54 }
 0x334   :  { %v4483_v20 = vadd.f32 %v4434_v49, %v2135_v45 }
 0x337   :  { %v2118_v48 = vpop.f32.mrb[132].mxu1 }
 0x338   :  { %v2136_v21 = vadd.f32 %v2118_v48, %v1951_v14  ;;  %v3337_v33 = vpop.f32.mrb[133].mxu1 }
 0x339   :  { %v2121_v27 = vpop.f32.mrb[134].mxu1 }
 0x33a   :  { %v3338_v59 = vpop.f32.mrb[135].mxu1  ;;  %v4486_v18 = vadd.f32 %v4438_v63, %v2136_v21 }
 0x33f   :  { %v2417_v39 = vpop.f32.mrb[136].mxu1 }
 0x340   :  { %v2471_v25 = vadd.f32 %v2417_v39, %v2311_v61  ;;  %v3377_v56 = vpop.f32.mrb[137].mxu1 }
 0x341   :  { %v2420_v52 = vpop.f32.mrb[138].mxu1 }
 0x342   :  { %v2491_v49 = vadd.f32 %v4491_v50, %v2471_v25  ;;  %v2472_v37 = vadd.f32 %v2420_v52, %v2312_v40  ;;  %v3378_v12 = vpop.f32.mrb[139].mxu1 }
 0x344   :  { %v2492_v14 = vadd.f32 %v4491_v50, %v2472_v37  ;;  %v2504_v6 = vmax.f32 %v2491_v49, 0.0 }
 0x346   :  { %v2505_v38 = vmax.f32 %v2492_v14, 0.0 }
 0x347   :  { %v2425_v42 = vpop.f32.mrb[140].mxu1 }
 0x348   :  { %v2517_v63 = vpack.c.bf16 %v2505_v38, %v2504_v6  ;;  %v2473_v47 = vadd.f32 %v2425_v42, %v2313_v16  ;;  %v3381_v10 = vpop.f32.mrb[141].mxu1 }
 0x349   :  { %v2428_v9 = vpop.f32.mrb[142].mxu1 }
 0x34a   :  { %v2493_v26 = vadd.f32 %v4491_v50, %v2473_v47  ;;  %v2474_v41 = vadd.f32 %v2428_v9, %v2314_v31  ;;  %v3382_v58 = vpop.f32.mrb[143].mxu1  ;;  %3404 = vmatpush3.bf16.msra.mxu0 %v2517_v63  ;;  %v3572_v63 = vmov 65535  }
 0x34b   :  { %3405 = vmatprep.subr.bf16.mxu0 %v3570_v35  ;;  %v3543_v58 = vld [vmem:[%s4561_s6 + $0x8] sm:$0xff]  }
 0x34c   :  { %v2494_v61 = vadd.f32 %v4491_v50, %v2474_v41  ;;  %v2506_v40 = vmax.f32 %v2493_v26, 0.0 }
 0x34e   :  { %v2507_v57 = vmax.f32 %v2494_v61, 0.0  ;;  %v3544_v61 = vld [vmem:[%s4561_s6 + $0x10] sm:$0xff]  }
 0x34f   :  { %v2433_v30 = vpop.f32.mrb[144].mxu1 }
 0x350   :  { %v2518_v44 = vpack.c.bf16 %v2507_v57, %v2506_v40  ;;  %v2475_v22 = vadd.f32 %v2433_v30, %v2315_v19  ;;  %v3385_v5 = vpop.f32.mrb[145].mxu1  ;;  %v3545_v40 = vld [vmem:[%s4561_s6 + $0x18] sm:$0xff]  }
 0x351   :  { %v2436_v46 = vpop.f32.mrb[146].mxu1 }
 0x352   :  { %v2495_v16 = vadd.f32 %v4491_v50, %v2475_v22  ;;  %v2476_v24 = vadd.f32 %v2436_v46, %v2316_v1  ;;  %v3386_v60 = vpop.f32.mrb[147].mxu1  ;;  %3406 = vmatpush3.bf16.msra.mxu0 %v2518_v44 }
 0x353   :  { %3407 = vmatprep.subr.bf16.mxu0 %v3570_v35 }
 0x354   :  { %v2496_v31 = vadd.f32 %v4491_v50, %v2476_v24  ;;  %v2508_v0 = vmax.f32 %v2495_v16, 0.0  ;;  %v2892_v16 = vld [vmem:[%s4562_s7] ss:$0 sm:$0xff] }
 0x356   :  { %v2509_v2 = vmax.f32 %v2496_v31, 0.0 }
 0x357   :  { %v2441_v36 = vpop.f32.mrb[148].mxu1 }
 0x358   :  { %v2519_v43 = vpack.c.bf16 %v2509_v2, %v2508_v0  ;;  %v2477_v4 = vadd.f32 %v2441_v36, %v4468_v55  ;;  %v3389_v7 = vpop.f32.mrb[149].mxu1 }
 0x359   :  { %v2444_v11 = vpop.f32.mrb[150].mxu1 }
 0x35a   :  { %v2497_v19 = vadd.f32 %v4491_v50, %v2477_v4  ;;  %v2478_v28 = vadd.f32 %v2444_v11, %v4471_v51  ;;  %v3390_v13 = vpop.f32.mrb[151].mxu1  ;;  %3408 = vmatpush3.bf16.msra.mxu0 %v2519_v43 }
 0x35b   :  { %3409 = vmatprep.subr.bf16.mxu0 %v3570_v35 }
 0x35c   :  { %v2498_v1 = vadd.f32 %v4491_v50, %v2478_v28  ;;  %v2510_v34 = vmax.f32 %v2497_v19, 0.0 }
 0x35e   :  { %v2511_v17 = vmax.f32 %v2498_v1, 0.0 }
 0x35f   :  { %v2449_v53 = vpop.f32.mrb[152].mxu1 }
 0x360   :  { %v2520_v23 = vpack.c.bf16 %v2511_v17, %v2510_v34  ;;  %v2479_v54 = vadd.f32 %v2449_v53, %v4474_v62  ;;  %v3393_v32 = vpop.f32.mrb[153].mxu1 }
 0x361   :  { %v2452_v55 = vpop.f32.mrb[154].mxu1 }
 0x362   :  { %v2499_v15 = vadd.f32 %v4491_v50, %v2479_v54  ;;  %v2480_v45 = vadd.f32 %v2452_v55, %v4477_v3  ;;  %v3394_v8 = vpop.f32.mrb[155].mxu1  ;;  %3410 = vmatpush3.bf16.msra.mxu0 %v2520_v23 }
 0x363   :  { %3411 = vmatprep.subr.bf16.mxu0 %v3570_v35 }
 0x364   :  { %v2500_v51 = vadd.f32 %v4491_v50, %v2480_v45  ;;  %v2512_v48 = vmax.f32 %v2499_v15, 0.0 }
 0x366   :  { %v2513_v21 = vmax.f32 %v2500_v51, 0.0 }
 0x367   :  { %v2457_v33 = vpop.f32.mrb[156].mxu1 }
 0x368   :  { %v2521_v27 = vpack.c.bf16 %v2513_v21, %v2512_v48  ;;  %v2481_v59 = vadd.f32 %v2457_v33, %v4480_v29  ;;  %v3397_v39 = vpop.f32.mrb[157].mxu1 }
 0x369   :  { %v2460_v62 = vpop.f32.mrb[158].mxu1 }
 0x36a   :  { %v2501_v25 = vadd.f32 %v4491_v50, %v2481_v59  ;;  %v2482_v56 = vadd.f32 %v2460_v62, %v4483_v20  ;;  %v3398_v52 = vpop.f32.mrb[159].mxu1  ;;  %3412 = vmatpush3.bf16.msra.mxu0 %v2521_v27  ;;  %v2531_v20 = vsel %vm2529_vm8, 4294967295, %v3572_v63 }
 0x36b   :  { %3413 = vmatprep.subr.bf16.mxu0 %v3570_v35  ;;  %v2532_v9 = vsel %vm2530_vm9, %v2531_v20, 0 }
 0x36c   :  { %v2502_v3 = vadd.f32 %v4491_v50, %v2482_v56  ;;  %v2514_v49 = vmax.f32 %v2501_v25, 0.0 }
 0x36e   :  { %v2515_v37 = vmax.f32 %v2502_v3, 0.0 }
 0x36f   :  { %v2465_v12 = vpop.f32.mrb[160].mxu1 }
 0x370   :  { %v2522_v14 = vpack.c.bf16 %v2515_v37, %v2514_v49  ;;  %v2483_v6 = vadd.f32 %v2465_v12, %v4486_v18  ;;  %v3401_v29 = vpop.f32.mrb[161].mxu1  ;;  %v2524_v18 = vld [vmem:[%s4560_s5] sm:$0x1] }
 0x371   :  { %v2468_v38 = vpop.f32.mrb[162].mxu1 }
 0x372   :  { %v2503_v42 = vadd.f32 %v4491_v50, %v2483_v6  ;;  %v3402_v47 = vpop.f32.mrb[163].mxu1  ;;  %3414 = vmatpush3.bf16.msra.mxu0 %v2522_v14  ;;  %v3542_v50 = vld [vmem:[%s4561_s6] sm:$0xff]   ;;  %s3546_s6 = scalar_lea.vmem %s2669_s0, 32 }
 0x373   :  { %3415 = vmatprep.subr.bf16.mxu0 %v3570_v35  ;;  %p3547_p0 = scmp.ne.s32.totalorder %s2669_s0, %s3546_s6  ;;  %p3552_p2 = scmp.lt.s32.totalorder %s3546_s6, %s3546_s6 }
 0x374   :  { %v2516_v10 = vmax.f32 %v2503_v42, 0.0 }
 0x375   :  { %p3553_p3 = por %p3552_p2, %p3551_p1 }
 0x376   :  { %v2523_v26 = vpack.c.bf16 %v2516_v10, %v2516_v10 }
 0x377   :  { %p3554_p4 = pnand %p3553_p3, %p3547_p0 }
 0x378   :  { %v2534_v41 = vand.u32 %v2532_v9, %v2523_v26 }
 0x37a   :  { %3416 = vmatpush3.bf16.msra.mxu0 %v2534_v41 }
 0x37b   :  { %3421 = vmatprep.subr.bf16.mxu0 %v3570_v35 }
 0x37d   :  { %3418 = vmatmul.mubr.msk.bf16.vlgmr.msra.gmra.mrb[116].mxu0 %vm2525_vm10, %v2524_v18 }
 0x37e   :  { %3422 = vmatpush3.bf16.msra.mxu0 %v3542_v50  ;;  %3429 = vmatprep.mubr.msk.bf16.mxu0 %vm3571_vm2, %v3570_v35 }
 0x37f   :  { %3423 = vmatprep.subr.bf16.mxu0 %v3570_v35 }
 0x382   :  { %3424 = vmatpush3.bf16.msra.mxu0 %v3543_v58 }
 0x383   :  { %3425 = vmatprep.subr.bf16.mxu0 %v3570_v35 }
 0x386   :  { %3426 = vmatpush3.bf16.msra.mxu0 %v3544_v61 }
 0x387   :  { %3427 = vmatprep.subr.bf16.mxu0 %v3570_v35 }
 0x38a   :  { %3428 = vmatpush3.bf16.msra.mxu0 %v3545_v40 }
 0x450   :  { %v2570_v57 = vpop.f32.mrb[116].mxu0 }
 0x451   :  { %v2576_v30 = vmul.f32 0.04, %v2570_v57  ;;  %v3419_v44 = vpop.f32.mrb[117].mxu0 }
 0x452   :  { %v2573_v22 = vpop.f32.mrb[118].mxu0 }
 0x453   :  { %v2577_v5 = vpack.c.bf16 %v2576_v30, %v2576_v30  ;;  %v3420_v46 = vpop.f32.mrb[119].mxu0 }
 0x455   :  { %3430 = vmatmul.mubr.msk.bf16.vlgmr.msra.gmra.mrb[120].mxu0 %vm2617_vm11, %v2577_v5 }
 0x528   :  { %v2655_v35 = vpop.f32.mrb[120].mxu0 }
 0x529   :  { %v2656_v24 = vadd.f32 %v2892_v16, %v2655_v35  ;;  %v3431_v60 = vpop.f32.mrb[121].mxu0 }
 0x52a   :  { %v2658_v31 = vpop.f32.mrb[122].mxu0 }
 0x52b   :  { %2661 = vst [vmem:[#allocation3] sm:$0x3] %v2656_v24  ;;  %v3432_v0 = vpop.f32.mrb[123].mxu0 }
 0x52c   :  { %3557 = shalt.err (!%p3554_p4)
}
 0x52d   :  { %s3558_s7 = scalar_lea.hbm %s4563_s8, 32 }
 0x52e   :  { %p3559_p5 = scmp.ne.s32.totalorder %s4563_s8, %s3558_s7  ;;  %p3562_p6 = scmp.lt.u32.totalorder %s3558_s7, %s4563_s8 }
 0x530   :  { %p3564_p7 = pnand %p3562_p6, %p3559_p5 }
 0x532   :  { %3567 = shalt.err (!%p3564_p7)
}
 0x533   :  { %2671 = dma.vmem_to_hbm [thread:$0]  %s2669_s0, 32, %s4563_s8, [#allocation4]  }
 0x534   :  { %3568 = dma.done.wait [#allocation4], 32  }
 0x535   :  { %3569 = vsyncadd [#allocation4], 4294967264 }
 0x536   :  { %2675 = vsyncpa [#allocation4], 1 }

</bundles_post_ra>
